<compile_context>
chip_gen: v6e
topology: v6e:2x2x1
jax: 0.10.0
libtpu: 0.0.40
codegen_flags: <defaults>
</compile_context>

<pallas_src>
import functools

import jax
import jax.numpy as jnp
import numpy as np
from jax import lax
from jax.experimental import pallas as pl
from jax.experimental.pallas import tpu as pltpu


def _double_conv_kernel(x_ref, w1_ref, w2_ref, p_ref, a_ref, m_ref, o_ref,
                        *, width, eps):
    """Fused (conv3x3 + GroupNorm + ReLU) x 2 for one batch element.

    x_ref : (Cin, HW)        flattened NCHW input tile (bf16)
    w1_ref: (9, Cout, Cin)   conv1 weights, tap-major (bf16)
    w2_ref: (9, Cout, Cout)  conv2 weights, tap-major (bf16)
    p_ref : (2, Cout, 3)     per-block packed [bias | gamma | beta] (f32)
    a_ref : (Cout, Cout)     group-averaging matrix, 1/(HW*Cpg) baked in (f32)
    m_ref : (9, 1, HW)       per-tap boundary-validity masks (f32, 0/1)
    o_ref : (Cout, HW)       output tile (f32) -> reshapes directly to NCHW
    """
    _, hw = x_ref.shape
    cout = o_ref.shape[0]
    a = a_ref[...]                                    # (Cout, Cout)
    masks = [m_ref[t] > 0.5 for t in range(9)]        # 9 x (1, HW) bool

    def shift_lanes(x, s):
        # y[:, p] = x[:, (p + s) % hw]; wrapped entries are killed by the mask.
        k = s % hw
        if k == 0:
            return x
        return jnp.concatenate([x[:, k:], x[:, :k]], axis=1)

    def conv3x3(xf, w_ref):
        # xf: (C, HW) f32.  Accumulate the 9 shifted taps on the MXU in f32.
        acc = jnp.zeros((cout, hw), jnp.float32)
        t = 0
        for dy in (-1, 0, 1):
            for dx in (-1, 0, 1):
                tap = shift_lanes(xf, dy * width + dx)
                tap = jnp.where(masks[t], tap, 0.0).astype(jnp.bfloat16)
                acc = acc + jnp.dot(w_ref[t], tap,
                                    preferred_element_type=jnp.float32)
                t += 1
        return acc

    def gn_relu(acc, p):
        # acc: (Cout, HW) f32;  p: (Cout, 3) = [bias | gamma | beta]
        acc = acc + p[:, 0:1]
        s1 = jnp.sum(acc, axis=-1, keepdims=True)         # (Cout, 1) lane reduce
        s2 = jnp.sum(acc * acc, axis=-1, keepdims=True)   # (Cout, 1)
        mean = jnp.dot(a, s1, preferred_element_type=jnp.float32)
        esq = jnp.dot(a, s2, preferred_element_type=jnp.float32)
        var = jnp.maximum(esq - mean * mean, 0.0)
        inv = lax.rsqrt(var + eps)
        return jnp.maximum((acc - mean) * inv * p[:, 1:2] + p[:, 2:3], 0.0)

    xf = x_ref[...].astype(jnp.float32)
    h = gn_relu(conv3x3(xf, w1_ref), p_ref[0])            # block 1, stays in VMEM
    y = gn_relu(conv3x3(h, w2_ref), p_ref[1])             # block 2
    o_ref[...] = y.astype(o_ref.dtype)


def double_conv2d(x_nchw, params):
    """Pallas implementation of DoubleConv2d.forward. Input/output are NCHW f32."""
    (w1, b1, g1, be1), (w2, b2, g2, be2) = params
    N, Cin, H, W = x_nchw.shape
    Cout = w1.shape[0]
    groups = Cout // 2
    Cpg = Cout // groups
    HW = H * W

    # Flatten to (N, Cin, HW); ship matmul operands in bf16 (halves input DMA,
    # doubles MXU rate). GroupNorm / affine / ReLU stay in fp32 in the kernel.
    x = x_nchw.reshape(N, Cin, HW).astype(jnp.bfloat16)
    # tap-major weights: w[o, i, kh, kw] -> (kh*3+kw, o, i)
    w1t = jnp.transpose(w1, (2, 3, 0, 1)).reshape(9, Cout, Cin).astype(jnp.bfloat16)
    w2t = jnp.transpose(w2, (2, 3, 0, 1)).reshape(9, Cout, Cout).astype(jnp.bfloat16)

    # Packed per-block affine params: (2, Cout, 3) = [bias | gamma | beta].
    p = jnp.stack([jnp.stack([b1, g1, be1], axis=-1),
                   jnp.stack([b2, g2, be2], axis=-1)]).astype(jnp.float32)

    # Group-averaging matrix with the 1/(HW*Cpg) divisor baked in.
    gidx = jnp.arange(Cout) // Cpg
    a_mat = (gidx[:, None] == gidx[None, :]).astype(jnp.float32) / float(HW * Cpg)

    # Per-tap validity masks over the flattened HW axis (shared by both convs).
    r = jnp.arange(H)[:, None]
    c = jnp.arange(W)[None, :]
    mask_list = []
    for dy in (-1, 0, 1):
        for dx in (-1, 0, 1):
            valid = (r + dy >= 0) & (r + dy < H) & (c + dx >= 0) & (c + dx < W)
            mask_list.append(valid.reshape(1, HW))
    m = jnp.stack(mask_list).astype(jnp.float32)          # (9, 1, HW)

    kernel = functools.partial(_double_conv_kernel, width=W, eps=1e-5)

    out = pl.pallas_call(
        kernel,
        out_shape=jax.ShapeDtypeStruct((N, Cout, HW), jnp.float32),
        grid_spec=pltpu.PrefetchScalarGridSpec(
            num_scalar_prefetch=0,
            grid=(N,),
            in_specs=[
                pl.BlockSpec((None, Cin, HW), lambda n: (n, 0, 0)),
                pl.BlockSpec((9, Cout, Cin), lambda n: (0, 0, 0)),
                pl.BlockSpec((9, Cout, Cout), lambda n: (0, 0, 0)),
                pl.BlockSpec((2, Cout, 3), lambda n: (0, 0, 0)),
                pl.BlockSpec((Cout, Cout), lambda n: (0, 0)),
                pl.BlockSpec((9, 1, HW), lambda n: (0, 0, 0)),
            ],
            out_specs=pl.BlockSpec((None, Cout, HW), lambda n: (n, 0, 0)),
        ),
        compiler_params=pltpu.CompilerParams(
            dimension_semantics=("parallel",)),
    )(x, w1t, w2t, p, a_mat, m)

    # (N, Cout, HW) is already channel-major -> reshape straight to NCHW.
    return out.reshape(N, Cout, H, W)


# ----------------------------- reference (pure JAX, fp32) --------------------
def _ref_groupnorm(x, gamma, beta, groups, eps=1e-5):
    N, C, H, W = x.shape
    xg = x.reshape(N, groups, C // groups, H, W)
    mean = xg.mean(axis=(2, 3, 4), keepdims=True)
    var = xg.var(axis=(2, 3, 4), keepdims=True)
    xn = ((xg - mean) / jnp.sqrt(var + eps)).reshape(N, C, H, W)
    return xn * gamma[None, :, None, None] + beta[None, :, None, None]


def _ref_block(x, w, b, gamma, beta, groups):
    y = lax.conv_general_dilated(
        x, w, window_strides=(1, 1), padding=((1, 1), (1, 1)),
        dimension_numbers=("NCHW", "OIHW", "NCHW"))
    y = y + b[None, :, None, None]
    y = _ref_groupnorm(y, gamma, beta, groups)
    return jnp.maximum(y, 0.0)


def _ref_double_conv(x, params):
    (w1, b1, g1, be1), (w2, b2, g2, be2) = params
    groups = w1.shape[0] // 2
    x = _ref_block(x, w1, b1, g1, be1, groups)
    x = _ref_block(x, w2, b2, g2, be2, groups)
    return x


# --------------------------------- main ---------------------------------------
if __name__ == "__main__":
    N, Cin, Cout, H, W = 2, 4, 8, 16, 16

    key = jax.random.PRNGKey(0)
    k = jax.random.split(key, 9)
    x = jax.random.normal(k[0], (N, Cin, H, W), jnp.float32)

    # Deterministic synthetic parameters (shapes follow nn.Conv2d / nn.GroupNorm).
    w1 = jax.random.normal(k[1], (Cout, Cin, 3, 3), jnp.float32) * 0.1
    b1 = jax.random.normal(k[2], (Cout,), jnp.float32) * 0.05
    g1 = 1.0 + 0.1 * jax.random.normal(k[3], (Cout,), jnp.float32)
    be1 = 0.05 * jax.random.normal(k[4], (Cout,), jnp.float32)
    w2 = jax.random.normal(k[5], (Cout, Cout, 3, 3), jnp.float32) * 0.1
    b2 = jax.random.normal(k[6], (Cout,), jnp.float32) * 0.05
    g2 = 1.0 + 0.1 * jax.random.normal(k[7], (Cout,), jnp.float32)
    be2 = 0.05 * jax.random.normal(k[8], (Cout,), jnp.float32)

    params = ((w1, b1, g1, be1), (w2, b2, g2, be2))

    fwd = jax.jit(double_conv2d)
    out = jax.block_until_ready(fwd(x, params))
    ref = jax.block_until_ready(_ref_double_conv(x, params))

    assert out.shape == (N, Cout, H, W)
    # Tolerance reflects bf16 MXU operands (fp32 accumulation + fp32 GroupNorm);
    # observed error is well inside this bound.
    assert np.allclose(np.asarray(out), np.asarray(ref), rtol=3e-2, atol=3e-2), (
        "Pallas DoubleConv2d does not match JAX reference; max abs diff = "
        f"{np.max(np.abs(np.asarray(out) - np.asarray(ref)))}")

    print("KERNEL_OK")
</pallas_src>

<mosaic_0001>
module attributes {stable_mosaic.version = 11 : i64} {
  func.func @_double_conv_kernel(%arg0: i32, %arg1: memref<1x4x256xbf16, #tpu.memory_space<vmem>>, %arg2: memref<9x8x4xbf16, #tpu.memory_space<vmem>>, %arg3: memref<9x8x8xbf16, #tpu.memory_space<vmem>>, %arg4: memref<2x8x3xf32, #tpu.memory_space<vmem>>, %arg5: memref<8x8xf32, #tpu.memory_space<vmem>>, %arg6: memref<9x1x256xf32, #tpu.memory_space<vmem>>, %arg7: memref<1x8x256xf32, #tpu.memory_space<vmem>>) attributes {dimension_semantics = [#tpu.dimension_semantics<parallel>], iteration_bounds = array<i64: 2>, scalar_prefetch = 0 : i64, scratch_operands = 0 : i64, tpu.core_type = #tpu.core_type<tc>, window_params = [{transform_indices = @transform_0, window_bounds = array<i64: 1, 4, 256>}, {pipeline_mode = #tpu.pipeline_mode<synchronous>, transform_indices = @transform_1, window_bounds = array<i64: 9, 8, 4>}, {pipeline_mode = #tpu.pipeline_mode<synchronous>, transform_indices = @transform_2, window_bounds = array<i64: 9, 8, 8>}, {pipeline_mode = #tpu.pipeline_mode<synchronous>, transform_indices = @transform_3, window_bounds = array<i64: 2, 8, 3>}, {pipeline_mode = #tpu.pipeline_mode<synchronous>, transform_indices = @transform_4, window_bounds = array<i64: 8, 8>}, {pipeline_mode = #tpu.pipeline_mode<synchronous>, transform_indices = @transform_5, window_bounds = array<i64: 9, 1, 256>}, {transform_indices = @transform_6, window_bounds = array<i64: 1, 8, 256>}]} {
    %c0 = arith.constant 0 : index
    %c0_0 = arith.constant 0 : index
    %0 = vector.load %arg5[%c0, %c0_0] : memref<8x8xf32, #tpu.memory_space<vmem>>, vector<8x8xf32>
    %c0_1 = arith.constant 0 : index
    %c0_2 = arith.constant 0 : index
    %c0_3 = arith.constant 0 : index
    %1 = vector.load %arg6[%c0_1, %c0_2, %c0_3] : memref<9x1x256xf32, #tpu.memory_space<vmem>>, vector<1x1x256xf32>
    %2 = vector.shape_cast %1 : vector<1x1x256xf32> to vector<1x256xf32>
    %cst = arith.constant 5.000000e-01 : f32
    %3 = vector.broadcast %cst : f32 to vector<1x256xf32>
    %4 = arith.cmpf ogt, %2, %3 : vector<1x256xf32>
    %c1 = arith.constant 1 : index
    %c0_4 = arith.constant 0 : index
    %c0_5 = arith.constant 0 : index
    %5 = vector.load %arg6[%c1, %c0_4, %c0_5] : memref<9x1x256xf32, #tpu.memory_space<vmem>>, vector<1x1x256xf32>
    %6 = vector.shape_cast %5 : vector<1x1x256xf32> to vector<1x256xf32>
    %cst_6 = arith.constant 5.000000e-01 : f32
    %7 = vector.broadcast %cst_6 : f32 to vector<1x256xf32>
    %8 = arith.cmpf ogt, %6, %7 : vector<1x256xf32>
    %c2 = arith.constant 2 : index
    %c0_7 = arith.constant 0 : index
    %c0_8 = arith.constant 0 : index
    %9 = vector.load %arg6[%c2, %c0_7, %c0_8] : memref<9x1x256xf32, #tpu.memory_space<vmem>>, vector<1x1x256xf32>
    %10 = vector.shape_cast %9 : vector<1x1x256xf32> to vector<1x256xf32>
    %cst_9 = arith.constant 5.000000e-01 : f32
    %11 = vector.broadcast %cst_9 : f32 to vector<1x256xf32>
    %12 = arith.cmpf ogt, %10, %11 : vector<1x256xf32>
    %c3 = arith.constant 3 : index
    %c0_10 = arith.constant 0 : index
    %c0_11 = arith.constant 0 : index
    %13 = vector.load %arg6[%c3, %c0_10, %c0_11] : memref<9x1x256xf32, #tpu.memory_space<vmem>>, vector<1x1x256xf32>
    %14 = vector.shape_cast %13 : vector<1x1x256xf32> to vector<1x256xf32>
    %cst_12 = arith.constant 5.000000e-01 : f32
    %15 = vector.broadcast %cst_12 : f32 to vector<1x256xf32>
    %16 = arith.cmpf ogt, %14, %15 : vector<1x256xf32>
    %c4 = arith.constant 4 : index
    %c0_13 = arith.constant 0 : index
    %c0_14 = arith.constant 0 : index
    %17 = vector.load %arg6[%c4, %c0_13, %c0_14] : memref<9x1x256xf32, #tpu.memory_space<vmem>>, vector<1x1x256xf32>
    %18 = vector.shape_cast %17 : vector<1x1x256xf32> to vector<1x256xf32>
    %cst_15 = arith.constant 5.000000e-01 : f32
    %19 = vector.broadcast %cst_15 : f32 to vector<1x256xf32>
    %20 = arith.cmpf ogt, %18, %19 : vector<1x256xf32>
    %c5 = arith.constant 5 : index
    %c0_16 = arith.constant 0 : index
    %c0_17 = arith.constant 0 : index
    %21 = vector.load %arg6[%c5, %c0_16, %c0_17] : memref<9x1x256xf32, #tpu.memory_space<vmem>>, vector<1x1x256xf32>
    %22 = vector.shape_cast %21 : vector<1x1x256xf32> to vector<1x256xf32>
    %cst_18 = arith.constant 5.000000e-01 : f32
    %23 = vector.broadcast %cst_18 : f32 to vector<1x256xf32>
    %24 = arith.cmpf ogt, %22, %23 : vector<1x256xf32>
    %c6 = arith.constant 6 : index
    %c0_19 = arith.constant 0 : index
    %c0_20 = arith.constant 0 : index
    %25 = vector.load %arg6[%c6, %c0_19, %c0_20] : memref<9x1x256xf32, #tpu.memory_space<vmem>>, vector<1x1x256xf32>
    %26 = vector.shape_cast %25 : vector<1x1x256xf32> to vector<1x256xf32>
    %cst_21 = arith.constant 5.000000e-01 : f32
    %27 = vector.broadcast %cst_21 : f32 to vector<1x256xf32>
    %28 = arith.cmpf ogt, %26, %27 : vector<1x256xf32>
    %c7 = arith.constant 7 : index
    %c0_22 = arith.constant 0 : index
    %c0_23 = arith.constant 0 : index
    %29 = vector.load %arg6[%c7, %c0_22, %c0_23] : memref<9x1x256xf32, #tpu.memory_space<vmem>>, vector<1x1x256xf32>
    %30 = vector.shape_cast %29 : vector<1x1x256xf32> to vector<1x256xf32>
    %cst_24 = arith.constant 5.000000e-01 : f32
    %31 = vector.broadcast %cst_24 : f32 to vector<1x256xf32>
    %32 = arith.cmpf ogt, %30, %31 : vector<1x256xf32>
    %c8 = arith.constant 8 : index
    %c0_25 = arith.constant 0 : index
    %c0_26 = arith.constant 0 : index
    %33 = vector.load %arg6[%c8, %c0_25, %c0_26] : memref<9x1x256xf32, #tpu.memory_space<vmem>>, vector<1x1x256xf32>
    %34 = vector.shape_cast %33 : vector<1x1x256xf32> to vector<1x256xf32>
    %cst_27 = arith.constant 5.000000e-01 : f32
    %35 = vector.broadcast %cst_27 : f32 to vector<1x256xf32>
    %36 = arith.cmpf ogt, %34, %35 : vector<1x256xf32>
    %c0_28 = arith.constant 0 : index
    %c0_29 = arith.constant 0 : index
    %c0_30 = arith.constant 0 : index
    %37 = vector.load %arg1[%c0_28, %c0_29, %c0_30] : memref<1x4x256xbf16, #tpu.memory_space<vmem>>, vector<1x4x256xbf16>
    %38 = vector.shape_cast %37 : vector<1x4x256xbf16> to vector<4x256xbf16>
    %39 = arith.extf %38 : vector<4x256xbf16> to vector<4x256xf32>
    %cst_31 = arith.constant 0.000000e+00 : f32
    %40 = vector.broadcast %cst_31 : f32 to vector<8x256xf32>
    %41 = vector.extract_strided_slice %39 {offsets = [0, 239], sizes = [4, 17], strides = [1, 1]} : vector<4x256xf32> to vector<4x17xf32>
    %42 = vector.extract_strided_slice %39 {offsets = [0, 0], sizes = [4, 239], strides = [1, 1]} : vector<4x256xf32> to vector<4x239xf32>
    %43 = tpu.concatenate %41, %42 in 1 : vector<4x17xf32>, vector<4x239xf32> -> vector<4x256xf32>
    %cst_32 = arith.constant 0.000000e+00 : f32
    %44 = vector.shape_cast %4 : vector<1x256xi1> to vector<1x256xi1>
    %45 = vector.broadcast %44 : vector<1x256xi1> to vector<4x256xi1>
    %46 = vector.broadcast %cst_32 : f32 to vector<4x256xf32>
    %47 = arith.select %45, %43, %46 : vector<4x256xi1>, vector<4x256xf32>
    %48 = arith.truncf %47 : vector<4x256xf32> to vector<4x256xbf16>
    %c0_33 = arith.constant 0 : index
    %c0_34 = arith.constant 0 : index
    %c0_35 = arith.constant 0 : index
    %49 = vector.load %arg2[%c0_33, %c0_34, %c0_35] : memref<9x8x4xbf16, #tpu.memory_space<vmem>>, vector<1x8x4xbf16>
    %50 = vector.shape_cast %49 : vector<1x8x4xbf16> to vector<8x4xbf16>
    %cst_36 = arith.constant dense<0.000000e+00> : vector<8x256xf32>
    %51 = tpu.matmul %50, %48, %cst_36 {dimension_numbers = #tpu.dot_dimension_numbers<[1], [0], [0], [1], [0, 0, 1, 1], [], []>} : vector<8x4xbf16>, vector<4x256xbf16>, vector<8x256xf32> -> vector<8x256xf32>
    %52 = arith.addf %40, %51 : vector<8x256xf32>
    %53 = vector.extract_strided_slice %39 {offsets = [0, 240], sizes = [4, 16], strides = [1, 1]} : vector<4x256xf32> to vector<4x16xf32>
    %54 = vector.extract_strided_slice %39 {offsets = [0, 0], sizes = [4, 240], strides = [1, 1]} : vector<4x256xf32> to vector<4x240xf32>
    %55 = tpu.concatenate %53, %54 in 1 : vector<4x16xf32>, vector<4x240xf32> -> vector<4x256xf32>
    %cst_37 = arith.constant 0.000000e+00 : f32
    %56 = vector.shape_cast %8 : vector<1x256xi1> to vector<1x256xi1>
    %57 = vector.broadcast %56 : vector<1x256xi1> to vector<4x256xi1>
    %58 = vector.broadcast %cst_37 : f32 to vector<4x256xf32>
    %59 = arith.select %57, %55, %58 : vector<4x256xi1>, vector<4x256xf32>
    %60 = arith.truncf %59 : vector<4x256xf32> to vector<4x256xbf16>
    %c1_38 = arith.constant 1 : index
    %c0_39 = arith.constant 0 : index
    %c0_40 = arith.constant 0 : index
    %61 = vector.load %arg2[%c1_38, %c0_39, %c0_40] : memref<9x8x4xbf16, #tpu.memory_space<vmem>>, vector<1x8x4xbf16>
    %62 = vector.shape_cast %61 : vector<1x8x4xbf16> to vector<8x4xbf16>
    %cst_41 = arith.constant dense<0.000000e+00> : vector<8x256xf32>
    %63 = tpu.matmul %62, %60, %cst_41 {dimension_numbers = #tpu.dot_dimension_numbers<[1], [0], [0], [1], [0, 0, 1, 1], [], []>} : vector<8x4xbf16>, vector<4x256xbf16>, vector<8x256xf32> -> vector<8x256xf32>
    %64 = arith.addf %52, %63 : vector<8x256xf32>
    %65 = vector.extract_strided_slice %39 {offsets = [0, 241], sizes = [4, 15], strides = [1, 1]} : vector<4x256xf32> to vector<4x15xf32>
    %66 = vector.extract_strided_slice %39 {offsets = [0, 0], sizes = [4, 241], strides = [1, 1]} : vector<4x256xf32> to vector<4x241xf32>
    %67 = tpu.concatenate %65, %66 in 1 : vector<4x15xf32>, vector<4x241xf32> -> vector<4x256xf32>
    %cst_42 = arith.constant 0.000000e+00 : f32
    %68 = vector.shape_cast %12 : vector<1x256xi1> to vector<1x256xi1>
    %69 = vector.broadcast %68 : vector<1x256xi1> to vector<4x256xi1>
    %70 = vector.broadcast %cst_42 : f32 to vector<4x256xf32>
    %71 = arith.select %69, %67, %70 : vector<4x256xi1>, vector<4x256xf32>
    %72 = arith.truncf %71 : vector<4x256xf32> to vector<4x256xbf16>
    %c2_43 = arith.constant 2 : index
    %c0_44 = arith.constant 0 : index
    %c0_45 = arith.constant 0 : index
    %73 = vector.load %arg2[%c2_43, %c0_44, %c0_45] : memref<9x8x4xbf16, #tpu.memory_space<vmem>>, vector<1x8x4xbf16>
    %74 = vector.shape_cast %73 : vector<1x8x4xbf16> to vector<8x4xbf16>
    %cst_46 = arith.constant dense<0.000000e+00> : vector<8x256xf32>
    %75 = tpu.matmul %74, %72, %cst_46 {dimension_numbers = #tpu.dot_dimension_numbers<[1], [0], [0], [1], [0, 0, 1, 1], [], []>} : vector<8x4xbf16>, vector<4x256xbf16>, vector<8x256xf32> -> vector<8x256xf32>
    %76 = arith.addf %64, %75 : vector<8x256xf32>
    %77 = vector.extract_strided_slice %39 {offsets = [0, 255], sizes = [4, 1], strides = [1, 1]} : vector<4x256xf32> to vector<4x1xf32>
    %78 = vector.extract_strided_slice %39 {offsets = [0, 0], sizes = [4, 255], strides = [1, 1]} : vector<4x256xf32> to vector<4x255xf32>
    %79 = tpu.concatenate %77, %78 in 1 : vector<4x1xf32>, vector<4x255xf32> -> vector<4x256xf32>
    %cst_47 = arith.constant 0.000000e+00 : f32
    %80 = vector.shape_cast %16 : vector<1x256xi1> to vector<1x256xi1>
    %81 = vector.broadcast %80 : vector<1x256xi1> to vector<4x256xi1>
    %82 = vector.broadcast %cst_47 : f32 to vector<4x256xf32>
    %83 = arith.select %81, %79, %82 : vector<4x256xi1>, vector<4x256xf32>
    %84 = arith.truncf %83 : vector<4x256xf32> to vector<4x256xbf16>
    %c3_48 = arith.constant 3 : index
    %c0_49 = arith.constant 0 : index
    %c0_50 = arith.constant 0 : index
    %85 = vector.load %arg2[%c3_48, %c0_49, %c0_50] : memref<9x8x4xbf16, #tpu.memory_space<vmem>>, vector<1x8x4xbf16>
    %86 = vector.shape_cast %85 : vector<1x8x4xbf16> to vector<8x4xbf16>
    %cst_51 = arith.constant dense<0.000000e+00> : vector<8x256xf32>
    %87 = tpu.matmul %86, %84, %cst_51 {dimension_numbers = #tpu.dot_dimension_numbers<[1], [0], [0], [1], [0, 0, 1, 1], [], []>} : vector<8x4xbf16>, vector<4x256xbf16>, vector<8x256xf32> -> vector<8x256xf32>
    %88 = arith.addf %76, %87 : vector<8x256xf32>
    %cst_52 = arith.constant 0.000000e+00 : f32
    %89 = vector.shape_cast %20 : vector<1x256xi1> to vector<1x256xi1>
    %90 = vector.broadcast %89 : vector<1x256xi1> to vector<4x256xi1>
    %91 = vector.broadcast %cst_52 : f32 to vector<4x256xf32>
    %92 = arith.select %90, %39, %91 : vector<4x256xi1>, vector<4x256xf32>
    %93 = arith.truncf %92 : vector<4x256xf32> to vector<4x256xbf16>
    %c4_53 = arith.constant 4 : index
    %c0_54 = arith.constant 0 : index
    %c0_55 = arith.constant 0 : index
    %94 = vector.load %arg2[%c4_53, %c0_54, %c0_55] : memref<9x8x4xbf16, #tpu.memory_space<vmem>>, vector<1x8x4xbf16>
    %95 = vector.shape_cast %94 : vector<1x8x4xbf16> to vector<8x4xbf16>
    %cst_56 = arith.constant dense<0.000000e+00> : vector<8x256xf32>
    %96 = tpu.matmul %95, %93, %cst_56 {dimension_numbers = #tpu.dot_dimension_numbers<[1], [0], [0], [1], [0, 0, 1, 1], [], []>} : vector<8x4xbf16>, vector<4x256xbf16>, vector<8x256xf32> -> vector<8x256xf32>
    %97 = arith.addf %88, %96 : vector<8x256xf32>
    %98 = vector.extract_strided_slice %39 {offsets = [0, 1], sizes = [4, 255], strides = [1, 1]} : vector<4x256xf32> to vector<4x255xf32>
    %99 = vector.extract_strided_slice %39 {offsets = [0, 0], sizes = [4, 1], strides = [1, 1]} : vector<4x256xf32> to vector<4x1xf32>
    %100 = tpu.concatenate %98, %99 in 1 : vector<4x255xf32>, vector<4x1xf32> -> vector<4x256xf32>
    %cst_57 = arith.constant 0.000000e+00 : f32
    %101 = vector.shape_cast %24 : vector<1x256xi1> to vector<1x256xi1>
    %102 = vector.broadcast %101 : vector<1x256xi1> to vector<4x256xi1>
    %103 = vector.broadcast %cst_57 : f32 to vector<4x256xf32>
    %104 = arith.select %102, %100, %103 : vector<4x256xi1>, vector<4x256xf32>
    %105 = arith.truncf %104 : vector<4x256xf32> to vector<4x256xbf16>
    %c5_58 = arith.constant 5 : index
    %c0_59 = arith.constant 0 : index
    %c0_60 = arith.constant 0 : index
    %106 = vector.load %arg2[%c5_58, %c0_59, %c0_60] : memref<9x8x4xbf16, #tpu.memory_space<vmem>>, vector<1x8x4xbf16>
    %107 = vector.shape_cast %106 : vector<1x8x4xbf16> to vector<8x4xbf16>
    %cst_61 = arith.constant dense<0.000000e+00> : vector<8x256xf32>
    %108 = tpu.matmul %107, %105, %cst_61 {dimension_numbers = #tpu.dot_dimension_numbers<[1], [0], [0], [1], [0, 0, 1, 1], [], []>} : vector<8x4xbf16>, vector<4x256xbf16>, vector<8x256xf32> -> vector<8x256xf32>
    %109 = arith.addf %97, %108 : vector<8x256xf32>
    %110 = vector.extract_strided_slice %39 {offsets = [0, 15], sizes = [4, 241], strides = [1, 1]} : vector<4x256xf32> to vector<4x241xf32>
    %111 = vector.extract_strided_slice %39 {offsets = [0, 0], sizes = [4, 15], strides = [1, 1]} : vector<4x256xf32> to vector<4x15xf32>
    %112 = tpu.concatenate %110, %111 in 1 : vector<4x241xf32>, vector<4x15xf32> -> vector<4x256xf32>
    %cst_62 = arith.constant 0.000000e+00 : f32
    %113 = vector.shape_cast %28 : vector<1x256xi1> to vector<1x256xi1>
    %114 = vector.broadcast %113 : vector<1x256xi1> to vector<4x256xi1>
    %115 = vector.broadcast %cst_62 : f32 to vector<4x256xf32>
    %116 = arith.select %114, %112, %115 : vector<4x256xi1>, vector<4x256xf32>
    %117 = arith.truncf %116 : vector<4x256xf32> to vector<4x256xbf16>
    %c6_63 = arith.constant 6 : index
    %c0_64 = arith.constant 0 : index
    %c0_65 = arith.constant 0 : index
    %118 = vector.load %arg2[%c6_63, %c0_64, %c0_65] : memref<9x8x4xbf16, #tpu.memory_space<vmem>>, vector<1x8x4xbf16>
    %119 = vector.shape_cast %118 : vector<1x8x4xbf16> to vector<8x4xbf16>
    %cst_66 = arith.constant dense<0.000000e+00> : vector<8x256xf32>
    %120 = tpu.matmul %119, %117, %cst_66 {dimension_numbers = #tpu.dot_dimension_numbers<[1], [0], [0], [1], [0, 0, 1, 1], [], []>} : vector<8x4xbf16>, vector<4x256xbf16>, vector<8x256xf32> -> vector<8x256xf32>
    %121 = arith.addf %109, %120 : vector<8x256xf32>
    %122 = vector.extract_strided_slice %39 {offsets = [0, 16], sizes = [4, 240], strides = [1, 1]} : vector<4x256xf32> to vector<4x240xf32>
    %123 = vector.extract_strided_slice %39 {offsets = [0, 0], sizes = [4, 16], strides = [1, 1]} : vector<4x256xf32> to vector<4x16xf32>
    %124 = tpu.concatenate %122, %123 in 1 : vector<4x240xf32>, vector<4x16xf32> -> vector<4x256xf32>
    %cst_67 = arith.constant 0.000000e+00 : f32
    %125 = vector.shape_cast %32 : vector<1x256xi1> to vector<1x256xi1>
    %126 = vector.broadcast %125 : vector<1x256xi1> to vector<4x256xi1>
    %127 = vector.broadcast %cst_67 : f32 to vector<4x256xf32>
    %128 = arith.select %126, %124, %127 : vector<4x256xi1>, vector<4x256xf32>
    %129 = arith.truncf %128 : vector<4x256xf32> to vector<4x256xbf16>
    %c7_68 = arith.constant 7 : index
    %c0_69 = arith.constant 0 : index
    %c0_70 = arith.constant 0 : index
    %130 = vector.load %arg2[%c7_68, %c0_69, %c0_70] : memref<9x8x4xbf16, #tpu.memory_space<vmem>>, vector<1x8x4xbf16>
    %131 = vector.shape_cast %130 : vector<1x8x4xbf16> to vector<8x4xbf16>
    %cst_71 = arith.constant dense<0.000000e+00> : vector<8x256xf32>
    %132 = tpu.matmul %131, %129, %cst_71 {dimension_numbers = #tpu.dot_dimension_numbers<[1], [0], [0], [1], [0, 0, 1, 1], [], []>} : vector<8x4xbf16>, vector<4x256xbf16>, vector<8x256xf32> -> vector<8x256xf32>
    %133 = arith.addf %121, %132 : vector<8x256xf32>
    %134 = vector.extract_strided_slice %39 {offsets = [0, 17], sizes = [4, 239], strides = [1, 1]} : vector<4x256xf32> to vector<4x239xf32>
    %135 = vector.extract_strided_slice %39 {offsets = [0, 0], sizes = [4, 17], strides = [1, 1]} : vector<4x256xf32> to vector<4x17xf32>
    %136 = tpu.concatenate %134, %135 in 1 : vector<4x239xf32>, vector<4x17xf32> -> vector<4x256xf32>
    %cst_72 = arith.constant 0.000000e+00 : f32
    %137 = vector.shape_cast %36 : vector<1x256xi1> to vector<1x256xi1>
    %138 = vector.broadcast %137 : vector<1x256xi1> to vector<4x256xi1>
    %139 = vector.broadcast %cst_72 : f32 to vector<4x256xf32>
    %140 = arith.select %138, %136, %139 : vector<4x256xi1>, vector<4x256xf32>
    %141 = arith.truncf %140 : vector<4x256xf32> to vector<4x256xbf16>
    %c8_73 = arith.constant 8 : index
    %c0_74 = arith.constant 0 : index
    %c0_75 = arith.constant 0 : index
    %142 = vector.load %arg2[%c8_73, %c0_74, %c0_75] : memref<9x8x4xbf16, #tpu.memory_space<vmem>>, vector<1x8x4xbf16>
    %143 = vector.shape_cast %142 : vector<1x8x4xbf16> to vector<8x4xbf16>
    %cst_76 = arith.constant dense<0.000000e+00> : vector<8x256xf32>
    %144 = tpu.matmul %143, %141, %cst_76 {dimension_numbers = #tpu.dot_dimension_numbers<[1], [0], [0], [1], [0, 0, 1, 1], [], []>} : vector<8x4xbf16>, vector<4x256xbf16>, vector<8x256xf32> -> vector<8x256xf32>
    %145 = arith.addf %133, %144 : vector<8x256xf32>
    %c0_77 = arith.constant 0 : index
    %c0_78 = arith.constant 0 : index
    %c0_79 = arith.constant 0 : index
    %146 = vector.load %arg4[%c0_77, %c0_78, %c0_79] : memref<2x8x3xf32, #tpu.memory_space<vmem>>, vector<1x8x3xf32>
    %147 = vector.shape_cast %146 : vector<1x8x3xf32> to vector<8x3xf32>
    %148 = vector.extract_strided_slice %147 {offsets = [0, 0], sizes = [8, 1], strides = [1, 1]} : vector<8x3xf32> to vector<8x1xf32>
    %149 = vector.broadcast %148 : vector<8x1xf32> to vector<8x256xf32>
    %150 = arith.addf %145, %149 : vector<8x256xf32>
    %cst_80 = arith.constant dense<0.000000e+00> : vector<8xf32>
    %151 = vector.multi_reduction <add>, %150, %cst_80 [1] : vector<8x256xf32> to vector<8xf32>
    %152 = vector.shape_cast %151 : vector<8xf32> to vector<8x1xf32>
    %153 = arith.mulf %150, %150 : vector<8x256xf32>
    %cst_81 = arith.constant dense<0.000000e+00> : vector<8xf32>
    %154 = vector.multi_reduction <add>, %153, %cst_81 [1] : vector<8x256xf32> to vector<8xf32>
    %155 = vector.shape_cast %154 : vector<8xf32> to vector<8x1xf32>
    %cst_82 = arith.constant dense<0.000000e+00> : vector<8x1xf32>
    %156 = tpu.matmul %0, %152, %cst_82 {dimension_numbers = #tpu.dot_dimension_numbers<[1], [0], [0], [1], [0, 0, 1, 1], [], []>} : vector<8x8xf32>, vector<8x1xf32>, vector<8x1xf32> -> vector<8x1xf32>
    %cst_83 = arith.constant dense<0.000000e+00> : vector<8x1xf32>
    %157 = tpu.matmul %0, %155, %cst_83 {dimension_numbers = #tpu.dot_dimension_numbers<[1], [0], [0], [1], [0, 0, 1, 1], [], []>} : vector<8x8xf32>, vector<8x1xf32>, vector<8x1xf32> -> vector<8x1xf32>
    %158 = arith.mulf %156, %156 : vector<8x1xf32>
    %159 = arith.subf %157, %158 : vector<8x1xf32>
    %cst_84 = arith.constant 0.000000e+00 : f32
    %160 = vector.broadcast %cst_84 : f32 to vector<8x1xf32>
    %161 = arith.maximumf %159, %160 : vector<8x1xf32>
    %cst_85 = arith.constant 9.99999974E-6 : f32
    %162 = vector.broadcast %cst_85 : f32 to vector<8x1xf32>
    %163 = arith.addf %161, %162 : vector<8x1xf32>
    %164 = math.rsqrt %163 : vector<8x1xf32>
    %165 = vector.broadcast %156 : vector<8x1xf32> to vector<8x256xf32>
    %166 = arith.subf %150, %165 : vector<8x256xf32>
    %167 = vector.broadcast %164 : vector<8x1xf32> to vector<8x256xf32>
    %168 = arith.mulf %166, %167 : vector<8x256xf32>
    %169 = vector.extract_strided_slice %147 {offsets = [0, 1], sizes = [8, 1], strides = [1, 1]} : vector<8x3xf32> to vector<8x1xf32>
    %170 = vector.broadcast %169 : vector<8x1xf32> to vector<8x256xf32>
    %171 = arith.mulf %168, %170 : vector<8x256xf32>
    %172 = vector.extract_strided_slice %147 {offsets = [0, 2], sizes = [8, 1], strides = [1, 1]} : vector<8x3xf32> to vector<8x1xf32>
    %173 = vector.broadcast %172 : vector<8x1xf32> to vector<8x256xf32>
    %174 = arith.addf %171, %173 : vector<8x256xf32>
    %cst_86 = arith.constant 0.000000e+00 : f32
    %175 = vector.broadcast %cst_86 : f32 to vector<8x256xf32>
    %176 = arith.maximumf %174, %175 : vector<8x256xf32>
    %cst_87 = arith.constant 0.000000e+00 : f32
    %177 = vector.broadcast %cst_87 : f32 to vector<8x256xf32>
    %178 = vector.extract_strided_slice %176 {offsets = [0, 239], sizes = [8, 17], strides = [1, 1]} : vector<8x256xf32> to vector<8x17xf32>
    %179 = vector.extract_strided_slice %176 {offsets = [0, 0], sizes = [8, 239], strides = [1, 1]} : vector<8x256xf32> to vector<8x239xf32>
    %180 = tpu.concatenate %178, %179 in 1 : vector<8x17xf32>, vector<8x239xf32> -> vector<8x256xf32>
    %cst_88 = arith.constant 0.000000e+00 : f32
    %181 = vector.shape_cast %4 : vector<1x256xi1> to vector<1x256xi1>
    %182 = vector.broadcast %181 : vector<1x256xi1> to vector<8x256xi1>
    %183 = vector.broadcast %cst_88 : f32 to vector<8x256xf32>
    %184 = arith.select %182, %180, %183 : vector<8x256xi1>, vector<8x256xf32>
    %185 = arith.truncf %184 : vector<8x256xf32> to vector<8x256xbf16>
    %c0_89 = arith.constant 0 : index
    %c0_90 = arith.constant 0 : index
    %c0_91 = arith.constant 0 : index
    %186 = vector.load %arg3[%c0_89, %c0_90, %c0_91] : memref<9x8x8xbf16, #tpu.memory_space<vmem>>, vector<1x8x8xbf16>
    %187 = vector.shape_cast %186 : vector<1x8x8xbf16> to vector<8x8xbf16>
    %cst_92 = arith.constant dense<0.000000e+00> : vector<8x256xf32>
    %188 = tpu.matmul %187, %185, %cst_92 {dimension_numbers = #tpu.dot_dimension_numbers<[1], [0], [0], [1], [0, 0, 1, 1], [], []>} : vector<8x8xbf16>, vector<8x256xbf16>, vector<8x256xf32> -> vector<8x256xf32>
    %189 = arith.addf %177, %188 : vector<8x256xf32>
    %190 = vector.extract_strided_slice %176 {offsets = [0, 240], sizes = [8, 16], strides = [1, 1]} : vector<8x256xf32> to vector<8x16xf32>
    %191 = vector.extract_strided_slice %176 {offsets = [0, 0], sizes = [8, 240], strides = [1, 1]} : vector<8x256xf32> to vector<8x240xf32>
    %192 = tpu.concatenate %190, %191 in 1 : vector<8x16xf32>, vector<8x240xf32> -> vector<8x256xf32>
    %cst_93 = arith.constant 0.000000e+00 : f32
    %193 = vector.shape_cast %8 : vector<1x256xi1> to vector<1x256xi1>
    %194 = vector.broadcast %193 : vector<1x256xi1> to vector<8x256xi1>
    %195 = vector.broadcast %cst_93 : f32 to vector<8x256xf32>
    %196 = arith.select %194, %192, %195 : vector<8x256xi1>, vector<8x256xf32>
    %197 = arith.truncf %196 : vector<8x256xf32> to vector<8x256xbf16>
    %c1_94 = arith.constant 1 : index
    %c0_95 = arith.constant 0 : index
    %c0_96 = arith.constant 0 : index
    %198 = vector.load %arg3[%c1_94, %c0_95, %c0_96] : memref<9x8x8xbf16, #tpu.memory_space<vmem>>, vector<1x8x8xbf16>
    %199 = vector.shape_cast %198 : vector<1x8x8xbf16> to vector<8x8xbf16>
    %cst_97 = arith.constant dense<0.000000e+00> : vector<8x256xf32>
    %200 = tpu.matmul %199, %197, %cst_97 {dimension_numbers = #tpu.dot_dimension_numbers<[1], [0], [0], [1], [0, 0, 1, 1], [], []>} : vector<8x8xbf16>, vector<8x256xbf16>, vector<8x256xf32> -> vector<8x256xf32>
    %201 = arith.addf %189, %200 : vector<8x256xf32>
    %202 = vector.extract_strided_slice %176 {offsets = [0, 241], sizes = [8, 15], strides = [1, 1]} : vector<8x256xf32> to vector<8x15xf32>
    %203 = vector.extract_strided_slice %176 {offsets = [0, 0], sizes = [8, 241], strides = [1, 1]} : vector<8x256xf32> to vector<8x241xf32>
    %204 = tpu.concatenate %202, %203 in 1 : vector<8x15xf32>, vector<8x241xf32> -> vector<8x256xf32>
    %cst_98 = arith.constant 0.000000e+00 : f32
    %205 = vector.shape_cast %12 : vector<1x256xi1> to vector<1x256xi1>
    %206 = vector.broadcast %205 : vector<1x256xi1> to vector<8x256xi1>
    %207 = vector.broadcast %cst_98 : f32 to vector<8x256xf32>
    %208 = arith.select %206, %204, %207 : vector<8x256xi1>, vector<8x256xf32>
    %209 = arith.truncf %208 : vector<8x256xf32> to vector<8x256xbf16>
    %c2_99 = arith.constant 2 : index
    %c0_100 = arith.constant 0 : index
    %c0_101 = arith.constant 0 : index
    %210 = vector.load %arg3[%c2_99, %c0_100, %c0_101] : memref<9x8x8xbf16, #tpu.memory_space<vmem>>, vector<1x8x8xbf16>
    %211 = vector.shape_cast %210 : vector<1x8x8xbf16> to vector<8x8xbf16>
    %cst_102 = arith.constant dense<0.000000e+00> : vector<8x256xf32>
    %212 = tpu.matmul %211, %209, %cst_102 {dimension_numbers = #tpu.dot_dimension_numbers<[1], [0], [0], [1], [0, 0, 1, 1], [], []>} : vector<8x8xbf16>, vector<8x256xbf16>, vector<8x256xf32> -> vector<8x256xf32>
    %213 = arith.addf %201, %212 : vector<8x256xf32>
    %214 = vector.extract_strided_slice %176 {offsets = [0, 255], sizes = [8, 1], strides = [1, 1]} : vector<8x256xf32> to vector<8x1xf32>
    %215 = vector.extract_strided_slice %176 {offsets = [0, 0], sizes = [8, 255], strides = [1, 1]} : vector<8x256xf32> to vector<8x255xf32>
    %216 = tpu.concatenate %214, %215 in 1 : vector<8x1xf32>, vector<8x255xf32> -> vector<8x256xf32>
    %cst_103 = arith.constant 0.000000e+00 : f32
    %217 = vector.shape_cast %16 : vector<1x256xi1> to vector<1x256xi1>
    %218 = vector.broadcast %217 : vector<1x256xi1> to vector<8x256xi1>
    %219 = vector.broadcast %cst_103 : f32 to vector<8x256xf32>
    %220 = arith.select %218, %216, %219 : vector<8x256xi1>, vector<8x256xf32>
    %221 = arith.truncf %220 : vector<8x256xf32> to vector<8x256xbf16>
    %c3_104 = arith.constant 3 : index
    %c0_105 = arith.constant 0 : index
    %c0_106 = arith.constant 0 : index
    %222 = vector.load %arg3[%c3_104, %c0_105, %c0_106] : memref<9x8x8xbf16, #tpu.memory_space<vmem>>, vector<1x8x8xbf16>
    %223 = vector.shape_cast %222 : vector<1x8x8xbf16> to vector<8x8xbf16>
    %cst_107 = arith.constant dense<0.000000e+00> : vector<8x256xf32>
    %224 = tpu.matmul %223, %221, %cst_107 {dimension_numbers = #tpu.dot_dimension_numbers<[1], [0], [0], [1], [0, 0, 1, 1], [], []>} : vector<8x8xbf16>, vector<8x256xbf16>, vector<8x256xf32> -> vector<8x256xf32>
    %225 = arith.addf %213, %224 : vector<8x256xf32>
    %cst_108 = arith.constant 0.000000e+00 : f32
    %226 = vector.shape_cast %20 : vector<1x256xi1> to vector<1x256xi1>
    %227 = vector.broadcast %226 : vector<1x256xi1> to vector<8x256xi1>
    %228 = vector.broadcast %cst_108 : f32 to vector<8x256xf32>
    %229 = arith.select %227, %176, %228 : vector<8x256xi1>, vector<8x256xf32>
    %230 = arith.truncf %229 : vector<8x256xf32> to vector<8x256xbf16>
    %c4_109 = arith.constant 4 : index
    %c0_110 = arith.constant 0 : index
    %c0_111 = arith.constant 0 : index
    %231 = vector.load %arg3[%c4_109, %c0_110, %c0_111] : memref<9x8x8xbf16, #tpu.memory_space<vmem>>, vector<1x8x8xbf16>
    %232 = vector.shape_cast %231 : vector<1x8x8xbf16> to vector<8x8xbf16>
    %cst_112 = arith.constant dense<0.000000e+00> : vector<8x256xf32>
    %233 = tpu.matmul %232, %230, %cst_112 {dimension_numbers = #tpu.dot_dimension_numbers<[1], [0], [0], [1], [0, 0, 1, 1], [], []>} : vector<8x8xbf16>, vector<8x256xbf16>, vector<8x256xf32> -> vector<8x256xf32>
    %234 = arith.addf %225, %233 : vector<8x256xf32>
    %235 = vector.extract_strided_slice %176 {offsets = [0, 1], sizes = [8, 255], strides = [1, 1]} : vector<8x256xf32> to vector<8x255xf32>
    %236 = vector.extract_strided_slice %176 {offsets = [0, 0], sizes = [8, 1], strides = [1, 1]} : vector<8x256xf32> to vector<8x1xf32>
    %237 = tpu.concatenate %235, %236 in 1 : vector<8x255xf32>, vector<8x1xf32> -> vector<8x256xf32>
    %cst_113 = arith.constant 0.000000e+00 : f32
    %238 = vector.shape_cast %24 : vector<1x256xi1> to vector<1x256xi1>
    %239 = vector.broadcast %238 : vector<1x256xi1> to vector<8x256xi1>
    %240 = vector.broadcast %cst_113 : f32 to vector<8x256xf32>
    %241 = arith.select %239, %237, %240 : vector<8x256xi1>, vector<8x256xf32>
    %242 = arith.truncf %241 : vector<8x256xf32> to vector<8x256xbf16>
    %c5_114 = arith.constant 5 : index
    %c0_115 = arith.constant 0 : index
    %c0_116 = arith.constant 0 : index
    %243 = vector.load %arg3[%c5_114, %c0_115, %c0_116] : memref<9x8x8xbf16, #tpu.memory_space<vmem>>, vector<1x8x8xbf16>
    %244 = vector.shape_cast %243 : vector<1x8x8xbf16> to vector<8x8xbf16>
    %cst_117 = arith.constant dense<0.000000e+00> : vector<8x256xf32>
    %245 = tpu.matmul %244, %242, %cst_117 {dimension_numbers = #tpu.dot_dimension_numbers<[1], [0], [0], [1], [0, 0, 1, 1], [], []>} : vector<8x8xbf16>, vector<8x256xbf16>, vector<8x256xf32> -> vector<8x256xf32>
    %246 = arith.addf %234, %245 : vector<8x256xf32>
    %247 = vector.extract_strided_slice %176 {offsets = [0, 15], sizes = [8, 241], strides = [1, 1]} : vector<8x256xf32> to vector<8x241xf32>
    %248 = vector.extract_strided_slice %176 {offsets = [0, 0], sizes = [8, 15], strides = [1, 1]} : vector<8x256xf32> to vector<8x15xf32>
    %249 = tpu.concatenate %247, %248 in 1 : vector<8x241xf32>, vector<8x15xf32> -> vector<8x256xf32>
    %cst_118 = arith.constant 0.000000e+00 : f32
    %250 = vector.shape_cast %28 : vector<1x256xi1> to vector<1x256xi1>
    %251 = vector.broadcast %250 : vector<1x256xi1> to vector<8x256xi1>
    %252 = vector.broadcast %cst_118 : f32 to vector<8x256xf32>
    %253 = arith.select %251, %249, %252 : vector<8x256xi1>, vector<8x256xf32>
    %254 = arith.truncf %253 : vector<8x256xf32> to vector<8x256xbf16>
    %c6_119 = arith.constant 6 : index
    %c0_120 = arith.constant 0 : index
    %c0_121 = arith.constant 0 : index
    %255 = vector.load %arg3[%c6_119, %c0_120, %c0_121] : memref<9x8x8xbf16, #tpu.memory_space<vmem>>, vector<1x8x8xbf16>
    %256 = vector.shape_cast %255 : vector<1x8x8xbf16> to vector<8x8xbf16>
    %cst_122 = arith.constant dense<0.000000e+00> : vector<8x256xf32>
    %257 = tpu.matmul %256, %254, %cst_122 {dimension_numbers = #tpu.dot_dimension_numbers<[1], [0], [0], [1], [0, 0, 1, 1], [], []>} : vector<8x8xbf16>, vector<8x256xbf16>, vector<8x256xf32> -> vector<8x256xf32>
    %258 = arith.addf %246, %257 : vector<8x256xf32>
    %259 = vector.extract_strided_slice %176 {offsets = [0, 16], sizes = [8, 240], strides = [1, 1]} : vector<8x256xf32> to vector<8x240xf32>
    %260 = vector.extract_strided_slice %176 {offsets = [0, 0], sizes = [8, 16], strides = [1, 1]} : vector<8x256xf32> to vector<8x16xf32>
    %261 = tpu.concatenate %259, %260 in 1 : vector<8x240xf32>, vector<8x16xf32> -> vector<8x256xf32>
    %cst_123 = arith.constant 0.000000e+00 : f32
    %262 = vector.shape_cast %32 : vector<1x256xi1> to vector<1x256xi1>
    %263 = vector.broadcast %262 : vector<1x256xi1> to vector<8x256xi1>
    %264 = vector.broadcast %cst_123 : f32 to vector<8x256xf32>
    %265 = arith.select %263, %261, %264 : vector<8x256xi1>, vector<8x256xf32>
    %266 = arith.truncf %265 : vector<8x256xf32> to vector<8x256xbf16>
    %c7_124 = arith.constant 7 : index
    %c0_125 = arith.constant 0 : index
    %c0_126 = arith.constant 0 : index
    %267 = vector.load %arg3[%c7_124, %c0_125, %c0_126] : memref<9x8x8xbf16, #tpu.memory_space<vmem>>, vector<1x8x8xbf16>
    %268 = vector.shape_cast %267 : vector<1x8x8xbf16> to vector<8x8xbf16>
    %cst_127 = arith.constant dense<0.000000e+00> : vector<8x256xf32>
    %269 = tpu.matmul %268, %266, %cst_127 {dimension_numbers = #tpu.dot_dimension_numbers<[1], [0], [0], [1], [0, 0, 1, 1], [], []>} : vector<8x8xbf16>, vector<8x256xbf16>, vector<8x256xf32> -> vector<8x256xf32>
    %270 = arith.addf %258, %269 : vector<8x256xf32>
    %271 = vector.extract_strided_slice %176 {offsets = [0, 17], sizes = [8, 239], strides = [1, 1]} : vector<8x256xf32> to vector<8x239xf32>
    %272 = vector.extract_strided_slice %176 {offsets = [0, 0], sizes = [8, 17], strides = [1, 1]} : vector<8x256xf32> to vector<8x17xf32>
    %273 = tpu.concatenate %271, %272 in 1 : vector<8x239xf32>, vector<8x17xf32> -> vector<8x256xf32>
    %cst_128 = arith.constant 0.000000e+00 : f32
    %274 = vector.shape_cast %36 : vector<1x256xi1> to vector<1x256xi1>
    %275 = vector.broadcast %274 : vector<1x256xi1> to vector<8x256xi1>
    %276 = vector.broadcast %cst_128 : f32 to vector<8x256xf32>
    %277 = arith.select %275, %273, %276 : vector<8x256xi1>, vector<8x256xf32>
    %278 = arith.truncf %277 : vector<8x256xf32> to vector<8x256xbf16>
    %c8_129 = arith.constant 8 : index
    %c0_130 = arith.constant 0 : index
    %c0_131 = arith.constant 0 : index
    %279 = vector.load %arg3[%c8_129, %c0_130, %c0_131] : memref<9x8x8xbf16, #tpu.memory_space<vmem>>, vector<1x8x8xbf16>
    %280 = vector.shape_cast %279 : vector<1x8x8xbf16> to vector<8x8xbf16>
    %cst_132 = arith.constant dense<0.000000e+00> : vector<8x256xf32>
    %281 = tpu.matmul %280, %278, %cst_132 {dimension_numbers = #tpu.dot_dimension_numbers<[1], [0], [0], [1], [0, 0, 1, 1], [], []>} : vector<8x8xbf16>, vector<8x256xbf16>, vector<8x256xf32> -> vector<8x256xf32>
    %282 = arith.addf %270, %281 : vector<8x256xf32>
    %c1_133 = arith.constant 1 : index
    %c0_134 = arith.constant 0 : index
    %c0_135 = arith.constant 0 : index
    %283 = vector.load %arg4[%c1_133, %c0_134, %c0_135] : memref<2x8x3xf32, #tpu.memory_space<vmem>>, vector<1x8x3xf32>
    %284 = vector.shape_cast %283 : vector<1x8x3xf32> to vector<8x3xf32>
    %285 = vector.extract_strided_slice %284 {offsets = [0, 0], sizes = [8, 1], strides = [1, 1]} : vector<8x3xf32> to vector<8x1xf32>
    %286 = vector.broadcast %285 : vector<8x1xf32> to vector<8x256xf32>
    %287 = arith.addf %282, %286 : vector<8x256xf32>
    %cst_136 = arith.constant dense<0.000000e+00> : vector<8xf32>
    %288 = vector.multi_reduction <add>, %287, %cst_136 [1] : vector<8x256xf32> to vector<8xf32>
    %289 = vector.shape_cast %288 : vector<8xf32> to vector<8x1xf32>
    %290 = arith.mulf %287, %287 : vector<8x256xf32>
    %cst_137 = arith.constant dense<0.000000e+00> : vector<8xf32>
    %291 = vector.multi_reduction <add>, %290, %cst_137 [1] : vector<8x256xf32> to vector<8xf32>
    %292 = vector.shape_cast %291 : vector<8xf32> to vector<8x1xf32>
    %cst_138 = arith.constant dense<0.000000e+00> : vector<8x1xf32>
    %293 = tpu.matmul %0, %289, %cst_138 {dimension_numbers = #tpu.dot_dimension_numbers<[1], [0], [0], [1], [0, 0, 1, 1], [], []>} : vector<8x8xf32>, vector<8x1xf32>, vector<8x1xf32> -> vector<8x1xf32>
    %cst_139 = arith.constant dense<0.000000e+00> : vector<8x1xf32>
    %294 = tpu.matmul %0, %292, %cst_139 {dimension_numbers = #tpu.dot_dimension_numbers<[1], [0], [0], [1], [0, 0, 1, 1], [], []>} : vector<8x8xf32>, vector<8x1xf32>, vector<8x1xf32> -> vector<8x1xf32>
    %295 = arith.mulf %293, %293 : vector<8x1xf32>
    %296 = arith.subf %294, %295 : vector<8x1xf32>
    %cst_140 = arith.constant 0.000000e+00 : f32
    %297 = vector.broadcast %cst_140 : f32 to vector<8x1xf32>
    %298 = arith.maximumf %296, %297 : vector<8x1xf32>
    %cst_141 = arith.constant 9.99999974E-6 : f32
    %299 = vector.broadcast %cst_141 : f32 to vector<8x1xf32>
    %300 = arith.addf %298, %299 : vector<8x1xf32>
    %301 = math.rsqrt %300 : vector<8x1xf32>
    %302 = vector.broadcast %293 : vector<8x1xf32> to vector<8x256xf32>
    %303 = arith.subf %287, %302 : vector<8x256xf32>
    %304 = vector.broadcast %301 : vector<8x1xf32> to vector<8x256xf32>
    %305 = arith.mulf %303, %304 : vector<8x256xf32>
    %306 = vector.extract_strided_slice %284 {offsets = [0, 1], sizes = [8, 1], strides = [1, 1]} : vector<8x3xf32> to vector<8x1xf32>
    %307 = vector.broadcast %306 : vector<8x1xf32> to vector<8x256xf32>
    %308 = arith.mulf %305, %307 : vector<8x256xf32>
    %309 = vector.extract_strided_slice %284 {offsets = [0, 2], sizes = [8, 1], strides = [1, 1]} : vector<8x3xf32> to vector<8x1xf32>
    %310 = vector.broadcast %309 : vector<8x1xf32> to vector<8x256xf32>
    %311 = arith.addf %308, %310 : vector<8x256xf32>
    %cst_142 = arith.constant 0.000000e+00 : f32
    %312 = vector.broadcast %cst_142 : f32 to vector<8x256xf32>
    %313 = arith.maximumf %311, %312 : vector<8x256xf32>
    %c0_143 = arith.constant 0 : index
    %c0_144 = arith.constant 0 : index
    %c0_145 = arith.constant 0 : index
    %314 = vector.load %arg7[%c0_143, %c0_144, %c0_145] : memref<1x8x256xf32, #tpu.memory_space<vmem>>, vector<1x8x256xf32>
    %315 = vector.shape_cast %314 : vector<1x8x256xf32> to vector<8x256xf32>
    %316 = vector.shape_cast %313 : vector<8x256xf32> to vector<1x8x256xf32>
    tpu.vector_store %arg7[%c0_143, %c0_144, %c0_145], %316 {strides = array<i32>} : memref<1x8x256xf32, #tpu.memory_space<vmem>>, vector<1x8x256xf32>,
    return
  }
  func.func @transform_0(%arg0: i32) -> (i32, i32, i32) {
    %c0_i32 = arith.constant 0 : i32
    %c0_i32_0 = arith.constant 0 : i32
    %c0_i32_1 = arith.constant 0 : i32
    return %arg0, %c0_i32, %c0_i32_0 : i32, i32, i32
  }
  func.func @transform_1(%arg0: i32) -> (i32, i32, i32) {
    %c0_i32 = arith.constant 0 : i32
    %c0_i32_0 = arith.constant 0 : i32
    %c0_i32_1 = arith.constant 0 : i32
    %c0_i32_2 = arith.constant 0 : i32
    return %c0_i32, %c0_i32_0, %c0_i32_1 : i32, i32, i32
  }
  func.func @transform_2(%arg0: i32) -> (i32, i32, i32) {
    %c0_i32 = arith.constant 0 : i32
    %c0_i32_0 = arith.constant 0 : i32
    %c0_i32_1 = arith.constant 0 : i32
    %c0_i32_2 = arith.constant 0 : i32
    return %c0_i32, %c0_i32_0, %c0_i32_1 : i32, i32, i32
  }
  func.func @transform_3(%arg0: i32) -> (i32, i32, i32) {
    %c0_i32 = arith.constant 0 : i32
    %c0_i32_0 = arith.constant 0 : i32
    %c0_i32_1 = arith.constant 0 : i32
    %c0_i32_2 = arith.constant 0 : i32
    return %c0_i32, %c0_i32_0, %c0_i32_1 : i32, i32, i32
  }
  func.func @transform_4(%arg0: i32) -> (i32, i32) {
    %c0_i32 = arith.constant 0 : i32
    %c0_i32_0 = arith.constant 0 : i32
    %c0_i32_1 = arith.constant 0 : i32
    return %c0_i32, %c0_i32_0 : i32, i32
  }
  func.func @transform_5(%arg0: i32) -> (i32, i32, i32) {
    %c0_i32 = arith.constant 0 : i32
    %c0_i32_0 = arith.constant 0 : i32
    %c0_i32_1 = arith.constant 0 : i32
    %c0_i32_2 = arith.constant 0 : i32
    return %c0_i32, %c0_i32_0, %c0_i32_1 : i32, i32, i32
  }
  func.func @transform_6(%arg0: i32) -> (i32, i32, i32) {
    %c0_i32 = arith.constant 0 : i32
    %c0_i32_0 = arith.constant 0 : i32
    %c0_i32_1 = arith.constant 0 : i32
    return %arg0, %c0_i32, %c0_i32_0 : i32, i32, i32
  }
}

</mosaic_0001>

<bundles_post_ra>
// kernel: double_conv2d.1
= control target key start
LH: loop header
LB: loop body
LE: loop exit
PB: predicated region body
PF: predicated region fallthrough
CT: control target
= control target key end

     0   :  { %s2289_s21 = smov 0   ;;  %s2779_s0 = inlined_call_operand.vmem [shape: bf16[2,4,256], index: 0, kind: input, shape index: {}]   ;;  %s2780_s1 = inlined_call_operand.vmem [shape: bf16[9,8,4], index: 1, kind: input, shape index: {}]   ;;  %s2781_s2 = inlined_call_operand.vmem [shape: bf16[9,8,8], index: 2, kind: input, shape index: {}]   ;;  %s2782_s3 = inlined_call_operand.vmem [shape: f32[2,8,3], index: 3, kind: input, shape index: {}]   ;;  %s2783_s4 = inlined_call_operand.vmem [shape: f32[8,8], index: 4, kind: input, shape index: {}]   ;;  %s2784_s5 = inlined_call_operand.vmem [shape: f32[9,1,256], index: 5, kind: input, shape index: {}]   ;;  %s2785_s6 = inlined_call_operand.vmem [shape: f32[2,8,256], index: 6, kind: output, shape index: {}]  }
   0x1 LB: > { %s2015_s22 = sadd.s32 4294967295, %s2239_s21   ;;  %p2019_p0 = scmp.ge.s32.totalorder %s2239_s21, 1  ;;  %s2239_s21 = sphi %s2289_s21, %s16_s21  }
   0x2   : > { %p212_p1 = scmp.lt.s32.totalorder %s2239_s21, 3 }
   0x4   : > { %p213_p2 = pnand %p2019_p0, %p212_p1 }
   0x5   : > { %p242_p3 = scmp.lt.s32.totalorder (!%p213_p2), %s2015_s22, 1  ;;  %s2242_s27 = smov (!%p213_p2), 16  }
   0x6   : > { %216 = sbr.rel (%p213_p2) target bundleno = 1723 (0x6bb), region = 44  ;;  %s2243_s28 = smov (!%p213_p2), 15  }
   0x7   : > { %s2244_s29 = smov (!%p213_p2), 17   ;;  %s2245_s30 = smov (!%p213_p2), 1  }
   0x8   : > { %s2246_s7 = smov (!%p213_p2), 127   ;;  %s2247_s8 = smov (!%p213_p2), 113  }
   0x9   : > { %s2248_s9 = smov (!%p213_p2), 112   ;;  %s2249_s10 = smov (!%p213_p2), 111  }
   0xb   : > { %v2241_v0 = vmov 0   ;;  %s2904_s22 = smov (!%p242_p3, %s2015_s22), 1  ;;  %v2328_v6 = vld [vmem:[%s2782_s3] sm:$0xff]  ;;  %v295_v7 = vlaneseq  ;;  %v2027_v8 = vld [vmem:[%s2784_s5 + $0x8] sm:$0x3]  ;;  %vm2787_vm6 = vcmask 130048  }
   0xc   : > { %380 = vmatprep.mubr.bf16.mxu0 %v2241_v0  ;;  %430 = vmatprep.mubr.bf16.mxu1 %v2241_v0  ;;  %s2091_s23 = sshll.u32 %s2904_s22, 2  ;;  %v2024_v9 = vld [vmem:[%s2784_s5 + $0x2] sm:$0x3]  ;;  %v254_v11 = vld [vmem:[%s2784_s5] sm:$0x3]  ;;  %vm267_vm0 = vcmp.gt.f32.partialorder %v2027_v8, 0.5 }
   0xd   : > { %2182 = vset.pattern.permute.xlu0 %v2241_v0  ;;  %2183 = vset.pattern.permute.xlu1 %v2241_v0  ;;  %s246_s26 = scalar_lea.vmem %s2779_s0, %s2091_s23  ;;  %v296_v10 = vshrl.u32 %v295_v7, 7  ;;  %v2025_v12 = vld [vmem:[%s2784_s5 + $0x4] sm:$0x3]  ;;  %vm258_vm1 = vcmp.gt.f32.partialorder %v2024_v9, 0.5  ;;  %v2026_v13 = vld [vmem:[%s2784_s5 + $0x6] sm:$0x3] }
   0xe   : > { %v280_v1 = vld [vmem:[%s246_s26] sm:$0xf]  ;;  %vm255_vm2 = vcmp.gt.f32.partialorder %v254_v11, 0.5  ;;  %v597_v14 = vsel %vm267_vm0, 1, %v2241_v0  ;;  %vm261_vm3 = vcmp.gt.f32.partialorder %v2025_v12, 0.5  ;;  %v320_v17 = vsel %vm258_vm1, 1, %v2241_v0 }
   0xf   : > { %v2307_v2 = vunpack.c.l.bf16 %v280_v1  ;;  %v2347_v15 = vsub.s32 1, %v296_v10  ;;  %v2349_v16 = vsub.s32 0, %v296_v10  ;;  %vm264_vm4 = vcmp.gt.f32.partialorder %v2026_v13, 0.5  ;;  %v2028_v18 = vld [vmem:[%s2784_s5 + $0xa] sm:$0x3]  ;;  %s2092_s23 = sshll.u32 %s2904_s22, 4 }
  0x10   : > { %v294_v19 = vsel %vm255_vm2, 1, %v2241_v0  ;;  %v2029_v21 = vld [vmem:[%s2784_s5 + $0xc] sm:$0x3]  ;;  %v449_v23 = vsel %vm261_vm3, 1, %v2241_v0  ;;  %v528_v25 = vsel %vm264_vm4, 1, %v2241_v0  ;;  %vm270_vm5 = vcmp.gt.f32.partialorder %v2028_v18, 0.5  ;;  %s251_s26 = scalar_lea.vmem %s2785_s6, %s2092_s23 }
  0x11   : > { %v2311_v3 = vcombine.high %v2307_v2, %v2307_v2  ;;  %v605_v20 = vrot.slane %v597_v14, %v2347_v15  ;;  %v601_v22 = vrot.slane %v597_v14, %v2349_v16  ;;  %v328_v24 = vrot.slane %v320_v17, %v2347_v15  ;;  %v2030_v28 = vld [vmem:[%s2784_s5 + $0xe] sm:$0x3]  ;;  %v2031_v50 = vld [vmem:[%s2784_s5 + $0x10] sm:$0x3]  ;;  %v1191_v46 = vld [vmem:[%s2781_s2] sm:$0xf] }
  0x12   : > { %v324_v26 = vrot.slane %v320_v17, %v2349_v16  ;;  %v302_v27 = vrot.slane %v294_v19, %v2347_v15  ;;  %vm273_vm7 = vcmp.gt.f32.partialorder %v2029_v21, 0.5  ;;  %v457_v29 = vrot.slane %v449_v23, %v2347_v15  ;;  %v2065_v13 = vld [vmem:[%s2781_s2 + $0x8] sm:$0xf] }
  0x13   : > { %v2142_v4 = vpack.i.bf16 %v2307_v2, %v2311_v3  ;;  %v2162_v5 = vpack.i.bf16 %v2311_v3, %v2307_v2  ;;  %v298_v30 = vrot.slane %v294_v19, %v2349_v16  ;;  %vm2371_vm8 = vcmp.eq.s32.totalorder %v605_v20, 1 }
  0x14   : > { %v2798_v31 = vmov 0  ;;  %vm2375_vm9 = vcmp.eq.s32.totalorder %v601_v22, 1  ;;  %v2800_v32 = vmov 0  ;;  %vm2786_vm10 = vcmask 121856  }
  0x15   : > { %2143 = vrot.lane.b32.xlu0 %v2142_v4, %s2242_s27  ;;  %2153 = vrot.lane.b32.xlu1 %v2142_v4, %s2243_s28  ;;  %v2799_v31 = vsel %vm2371_vm8, 4294967295, %v2798_v31  ;;  %v2801_v32 = vsel %vm2375_vm9, 4294967295, %v2800_v32  ;;  %v536_v33 = vrot.slane %v528_v25, %v2347_v15  ;;  %v453_v34 = vrot.slane %v449_v23, %v2349_v16 }
  0x16   : > { %v677_v35 = vsel %vm270_vm5, 1, %v2241_v0  ;;  %vm2382_vm11 = vcmp.eq.s32.totalorder %v328_v24, 1  ;;  %v532_v37 = vrot.slane %v528_v25, %v2349_v16  ;;  %v756_v38 = vsel %vm273_vm7, 1, %v2241_v0 }
  0x17   : > { %vm276_vm14 = vcmp.gt.f32.partialorder %v2030_v28, 0.5  ;;  %vm2388_vm15 = vcmp.eq.s32.totalorder %v324_v26, 1  ;;  %vm2392_vm0 = vcmp.eq.s32.totalorder %v302_v27, 1  ;;  %v2399_v41 = vsel %vm2371_vm8, %v2311_v3, 0.0 }
  0x18   : > { %v2404_v42 = vsel %vm2375_vm9, %v2307_v2, 0.0  ;;  %vm2406_vm1 = vcmp.eq.s32.totalorder %v457_v29, 1  ;;  %v2808_v43 = vmov 0  ;;  %vm2410_vm3 = vcmp.eq.s32.totalorder %v298_v30, 1  ;;  %v2032_v29 = vld [vmem:[%s2780_s1 + $0x4] sm:$0xf] }
  0x19   : > { %2148 = vrot.lane.b32.xlu0 %v2142_v4, %s2244_s29  ;;  %2158 = vrot.lane.b32.xlu1 %v2142_v4, %s2245_s30  ;;  %v2809_v43 = vsel %vm2406_vm1, 4294967295, %v2808_v43  ;;  %v685_v45 = vrot.slane %v677_v35, %v2347_v15  ;;  %vm2415_vm4 = vcmp.eq.s32.totalorder %v536_v33, 1  ;;  %vm2419_vm5 = vcmp.eq.s32.totalorder %v453_v34, 1 }
  0x1a   : > { %v2814_v47 = vmov 0  ;;  %v764_v48 = vrot.slane %v756_v38, %v2347_v15  ;;  %v2425_v49 = vsel %vm276_vm14, 1, %v2241_v0  ;;  %vm2430_vm2 = vcmp.eq.s32.totalorder %v532_v37, 1 }
  0x1b   : > { %v2815_v47 = vsel %vm2419_vm5, 4294967295, %v2814_v47  ;;  %v612_v54 = vpack.c.bf16 %v2399_v41, %v2399_v41  ;;  %v611_v55 = vpack.c.bf16 %v2404_v42, %v2404_v42  ;;  %v681_v56 = vrot.slane %v677_v35, %v2349_v16  ;;  %v2037_v41 = vld [vmem:[%s2780_s1 + $0x8] sm:$0xf] }
  0x1c   : > { %vm2439_vm13 = vcmp.eq.s32.totalorder %v685_v45, 1  ;;  %v843_v62 = vrot.slane %v2425_v49, %v2347_v15  ;;  %v760_v63 = vrot.slane %v756_v38, %v2349_v16  ;;  %vm2450_vm14 = vcmp.eq.s32.totalorder %v764_v48, 1 }
  0x1d   : > { %2163 = vrot.lane.b32.xlu0 %v2162_v5, %s2246_s7  ;;  %2168 = vrot.lane.b32.xlu1 %v2162_v5, %s2247_s8  ;;  %vm2824_vm7 = vcmask 1041408   ;;  %vm2826_vm9 = vcmask 138240   ;;  %v2829_v28 = vmov 0 }
  0x1e   : > { %vm2825_vm12 = vmmov %vm2824_vm7 }
  0x1f   : > { %vm2827_vm8 = vmmov %vm2826_vm9 }
  0x21   : > { %2173 = vrot.lane.b32.xlu0 %v2162_v5, %s2248_s9  ;;  %2178 = vrot.lane.b32.xlu1 %v2162_v5, %s2249_s10  ;;  %v2820_v5 = vmov 0 }
  0x22   : > { %v2821_v5 = vsel %vm2450_vm14, 4294967295, %v2820_v5 }
  0x25   : > { %986 = vperm.xlu0 %2182, %v2328_v6  }
  0x87   : > { %v2144_v51 = vpop.permute.xlu0 %2143  ;;  %v2154_v52 = vpop.permute.xlu1 %2153 }
  0x88   : > { %v2146_v57 = vunpack.i.h.bf16 %v2144_v51  ;;  %v2145_v58 = vunpack.i.l.bf16 %v2144_v51  ;;  %v2156_v59 = vunpack.i.h.bf16 %v2154_v52  ;;  %v2155_v60 = vunpack.i.l.bf16 %v2154_v52 }
  0x8a   : > { %v316_v1 = vsel %vm2787_vm6, %v2146_v57, %v2145_v58  ;;  %v445_v2 = vsel %vm2786_vm10, %v2156_v59, %v2155_v60  ;;  %v448_v3 = vsel %vm2786_vm10, %v2155_v60, %v2156_v59  ;;  %v319_v4 = vsel %vm2787_vm6, %v2145_v58, %v2146_v57 }
  0x8b   : > { %v2149_v7 = vpop.permute.xlu0 %2148  ;;  %v332_v8 = vsel %vm2382_vm11, %v316_v1, 0.0  ;;  %v461_v9 = vsel %vm2406_vm1, %v445_v2, 0.0  ;;  %v331_v10 = vsel %vm2388_vm15, %v319_v4, 0.0  ;;  %v2159_v11 = vpop.permute.xlu1 %2158  ;;  %v460_v12 = vsel %vm2419_vm5, %v448_v3, 0.0  ;;  %v309_v2 = vld [vmem:[%s2780_s1] sm:$0xf] }
  0x8c   : > { %vm2462_vm10 = vcmp.eq.s32.totalorder %v681_v56, 1  ;;  %v2151_v14 = vunpack.i.h.bf16 %v2149_v7  ;;  %v2150_v17 = vunpack.i.l.bf16 %v2149_v7  ;;  %v334_v18 = vpack.c.bf16 %v332_v8, %v332_v8  ;;  %v2068_v7 = vld [vmem:[%s2781_s2 + $0xc] sm:$0xf] }
  0x8d   : > { %v333_v19 = vpack.c.bf16 %v331_v10, %v331_v10  ;;  %v2161_v20 = vunpack.i.h.bf16 %v2159_v11  ;;  %v2160_v21 = vunpack.i.l.bf16 %v2159_v11  ;;  %v463_v22 = vpack.c.bf16 %v461_v9, %v461_v9 }
  0x8e   : > { %v462_v23 = vpack.c.bf16 %v460_v12, %v460_v12  ;;  %2033 = vmatprep.subr.msk.bf16.mxu0 %vm2824_vm7, %v334_v18  ;;  %v290_v25 = vsel %vm2826_vm9, %v2151_v14, %v2150_v17  ;;  %v293_v26 = vsel %vm2827_vm8, %v2150_v17, %v2151_v14  ;;  %vm2828_vm5 = vcmp.gt.f32.partialorder %v2031_v50, 0.5  ;;  %vm2833_vm8 = vmmov %vm2824_vm7 }
  0x8f   : > { %v343_v24 = vsel %vm2825_vm12, %v333_v19, 0  ;;  %v2472_v27 = vsel %vm2828_vm5, 1, %v2241_v0  ;;  %vm2474_vm1 = vcmp.eq.s32.totalorder %v760_v63, 1  ;;  %v306_v30 = vsel %vm2392_vm0, %v290_v25, 0.0  ;;  %v2164_v37 = vpop.permute.xlu0 %2163  ;;  %v2169_v38 = vpop.permute.xlu1 %2168  ;;  %vm2834_vm5 = vmmov %vm2824_vm7 }
  0x90   : > { %v2830_v28 = vsel %vm2474_vm1, 4294967295, %v2829_v28  ;;  %363 = vmatpush1.bf16.msra.mxu0 %v343_v24  ;;  %vm2831_vm12 = vcmask 7168   ;;  %v305_v35 = vsel %vm2410_vm3, %v293_v26, 0.0  ;;  %v308_v45 = vpack.c.bf16 %v306_v30, %v306_v30  ;;  %v2074_v30 = vld [vmem:[%s2781_s2 + $0x14] sm:$0xf] }
  0x91   : > { %v524_v33 = vsel %vm2831_vm12, %v2161_v20, %v2160_v21  ;;  %vm2832_vm9 = vmmov %vm2831_vm12  ;;  %v307_v50 = vpack.c.bf16 %v305_v35, %v305_v35  ;;  %2038 = vmatprep.subr.msk.bf16.mxu0 %vm2833_vm8, %v463_v22  ;;  %v470_v51 = vsel %vm2834_vm5, %v462_v23, 0  ;;  %v2166_v56 = vunpack.i.h.bf16 %v2164_v37  ;;  %v2040_v35 = vld [vmem:[%s2780_s1 + $0xc] sm:$0xf] }
  0x92   : > { %v527_v34 = vsel %vm2832_vm9, %v2160_v21, %v2161_v20  ;;  %v540_v48 = vsel %vm2415_vm4, %v524_v33, 0.0  ;;  %v2165_v57 = vunpack.i.l.bf16 %v2164_v37  ;;  %vm2835_vm7 = vcmask 31744   ;;  %vm2836_vm12 = vmmov %vm2834_vm5 }
  0x93   : > { %v542_v52 = vpack.c.bf16 %v540_v48, %v540_v48  ;;  %v539_v58 = vsel %vm2430_vm2, %v527_v34, 0.0  ;;  %2034 = vmatmul.mubr.msk.bf16.vlgmr.msra.gmra.mxu0 %vm2835_vm7, %v2032_v29  ;;  %2035 = vmatprep.subr.msk.bf16.mxu1 %vm2836_vm12, %v308_v45  ;;  %vm2837_vm9 = vmmov %vm2834_vm5  ;;  %v2171_v63 = vunpack.i.h.bf16 %v2169_v38  ;;  %v2170_v1 = vunpack.i.l.bf16 %v2169_v38  ;;  %v2174_v8 = vpop.permute.xlu0 %2173  ;;  %v2179_v9 = vpop.permute.xlu1 %2178 }
  0x94   : > { %v393_v59 = vsel %vm2837_vm9, %v307_v50, 0  ;;  %v541_v60 = vpack.c.bf16 %v539_v58, %v539_v58  ;;  %490 = vmatpush1.bf16.msra.mxu0 %v470_v51  ;;  %vm2838_vm8 = vcmask 1039360   ;;  %vm2501_vm6 = vcmp.eq.s32.totalorder %v843_v62, 1  ;;  %507 = vmatprep.mubr.bf16.mxu0 %v2241_v0  ;;  %vm2842_vm7 = vmmov %vm2837_vm9  ;;  %v2043_v51 = vld [vmem:[%s2780_s1 + $0x10] sm:$0xf] }
  0x95   : > { %413 = vmatpush1.bf16.msra.mxu1 %v393_v59  ;;  %v672_v3 = vsel %vm2838_vm8, %v2165_v57, %v2166_v56  ;;  %vm2839_vm5 = vmmov %vm2838_vm8  ;;  %v839_v10 = vrot.slane %v2425_v49, %v2349_v16  ;;  %vm2844_vm9 = vcmask 924672   ;;  %v922_v62 = vrot.slane %v2472_v27, %v2347_v15  ;;  %v2046_v59 = vld [vmem:[%s2780_s1 + $0x14] sm:$0xf] }
  0x96   : > { %v676_v4 = vsel %vm2839_vm5, %v2166_v56, %v2165_v57  ;;  %2041 = vmatprep.subr.msk.bf16.mxu1 %vm2842_vm7, %v542_v52  ;;  %vm2843_vm12 = vmmov %vm2842_vm7  ;;  %v755_v14 = vsel %vm2844_vm9, %v2171_v63, %v2170_v1  ;;  %v2176_v18 = vunpack.i.h.bf16 %v2174_v8  ;;  %v2175_v19 = vunpack.i.l.bf16 %v2174_v8 }
  0x97   : > { %v689_v11 = vsel %vm2439_vm13, %v676_v4, 0.0  ;;  %v549_v12 = vsel %vm2843_vm12, %v541_v60, 0  ;;  %vm2845_vm8 = vmmov %vm2842_vm7  ;;  %v768_v49 = vsel %vm2450_vm14, %v755_v14, 0.0  ;;  %vm2846_vm5 = vcmask 31744   ;;  %v2055_v4 = vld [vmem:[%s2780_s1 + $0x20] sm:$0xf] }
  0x98   : > { %2044 = vmatprep.subr.msk.bf16.mxu0 %vm2845_vm8, %v612_v54  ;;  %v691_v17 = vpack.c.bf16 %v689_v11, %v689_v11  ;;  %2036 = vmatmul.mubr.msk.bf16.vlgmr.msra.gmra.mxu1 %vm2846_vm5, %v309_v2  ;;  %vm2847_vm7 = vmmov %vm2844_vm9  ;;  %v688_v21 = vsel %vm2462_vm10, %v672_v3, 0.0  ;;  %v2181_v22 = vunpack.i.h.bf16 %v2179_v9  ;;  %v2180_v15 = vunpack.i.l.bf16 %v2179_v9  ;;  %v2052_v3 = vld [vmem:[%s2780_s1 + $0x1c] sm:$0xf] }
  0x99   : > { %v751_v20 = vsel %vm2847_vm7, %v2170_v1, %v2171_v63  ;;  %569 = vmatpush1.bf16.msra.mxu1 %v549_v12  ;;  %586 = vmatprep.mubr.bf16.mxu1 %v2241_v0  ;;  %vm2848_vm12 = vcmask 916480   ;;  %v619_v23 = vsel %vm2845_vm8, %v611_v55, 0  ;;  %vm2849_vm5 = vmmov %vm2845_vm8  ;;  %v690_v24 = vpack.c.bf16 %v688_v21, %v688_v21  ;;  %v2049_v1 = vld [vmem:[%s2780_s1 + $0x18] sm:$0xf] }
  0x9a   : > { %v834_v54 = vsel %vm2848_vm12, %v2176_v18, %v2175_v19  ;;  %2047 = vmatprep.subr.msk.bf16.mxu1 %vm2849_vm5, %v691_v17  ;;  %v770_v25 = vpack.c.bf16 %v768_v49, %v768_v49  ;;  %v767_v29 = vsel %vm2474_vm1, %v751_v20, 0.0  ;;  %vm2539_vm7 = vcmp.eq.s32.totalorder %v839_v10, 1 }
  0x9b   : > { %v847_v26 = vsel %vm2501_vm6, %v834_v54, 0.0  ;;  %vm2852_vm12 = vcmask 31744   ;;  %vm2853_vm9 = vcmask 916480   ;;  %vm2545_vm14 = vcmp.eq.s32.totalorder %v922_v62, 1 }
  0x9c   : > { %2039 = vmatmul.mubr.msk.bf16.vlgmr.msra.gmra.mxu0 %vm2852_vm12, %v2037_v41  ;;  %v830_v42 = vsel %vm2853_vm9, %v2175_v19, %v2176_v18  ;;  %v2854_v55 = vmov 0  ;;  %vm2856_vm8 = vcmask 908288   ;;  %v918_v34 = vrot.slane %v2472_v27, %v2349_v16  ;;  %vm2857_vm12 = vmmov %vm2849_vm5 }
  0x9d   : > { %v2855_v55 = vsel %vm2545_vm14, 4294967295, %v2854_v55  ;;  %v913_v33 = vsel %vm2856_vm8, %v2181_v22, %v2180_v15  ;;  %639 = vmatpush1.bf16.msra.mxu0 %v619_v23  ;;  %656 = vmatprep.mubr.bf16.mxu0 %v2241_v0  ;;  %v698_v37 = vsel %vm2849_vm5, %v690_v24, 0  ;;  %v769_v38 = vpack.c.bf16 %v767_v29, %v767_v29 }
  0x9e   : > { %2050 = vmatprep.subr.msk.bf16.mxu0 %vm2857_vm12, %v770_v25  ;;  %v849_v45 = vpack.c.bf16 %v847_v26, %v847_v26  ;;  %v926_v48 = vsel %vm2545_vm14, %v913_v33, 0.0  ;;  %v846_v50 = vsel %vm2539_vm7, %v830_v42, 0.0  ;;  %vm2858_vm9 = vcmask 31744   ;;  %vm2861_vm12 = vmmov %vm2849_vm5 }
  0x9f   : > { %v909_v16 = vsel %vm2856_vm8, %v2180_v15, %v2181_v22  ;;  %vm2564_vm1 = vcmp.eq.s32.totalorder %v918_v34, 1  ;;  %v777_v52 = vsel %vm2849_vm5, %v769_v38, 0  ;;  %v848_v56 = vpack.c.bf16 %v846_v50, %v846_v50  ;;  %vm2862_vm8 = vmmov %vm2849_vm5 }
  0xa0   : > { %2042 = vmatmul.mubr.msk.bf16.vlgmr.msra.gmra.mxu1 %vm2858_vm9, %v2040_v35  ;;  %v928_v57 = vpack.c.bf16 %v926_v48, %v926_v48  ;;  %v925_v58 = vsel %vm2564_vm1, %v909_v16, 0.0  ;;  %vm2863_vm14 = vmmov %vm2849_vm5  ;;  %v2250_v8 = vmov 0.0  }
  0xa1   : > { %718 = vmatpush1.bf16.msra.mxu1 %v698_v37  ;;  %735 = vmatprep.mubr.bf16.mxu1 %v2241_v0  ;;  %v856_v60 = vsel %vm2862_vm8, %v848_v56, 0  ;;  %v927_v63 = vpack.c.bf16 %v925_v58, %v925_v58  ;;  %vm2864_vm5 = vmmov %vm2858_vm9 }
  0xa2   : > { %2053 = vmatprep.subr.msk.bf16.mxu1 %vm2861_vm12, %v849_v45  ;;  %vm2865_vm12 = vmmov %vm2862_vm8 }
  0xa3   : > { %v935_v2 = vsel %vm2865_vm12, %v927_v63, 0  ;;  %vm2868_vm8 = vmmov %vm2864_vm5  ;;  %vm2797_vm12 = vcmask 64512  }
  0xa4   : > { %2045 = vmatmul.mubr.msk.bf16.vlgmr.msra.gmra.mxu0 %vm2858_vm9, %v2043_v51  ;;  %vm2866_vm9 = vmmov %vm2864_vm5 }
  0xa5   : > { %797 = vmatpush1.bf16.msra.mxu0 %v777_v52  ;;  %814 = vmatprep.mubr.bf16.mxu0 %v2241_v0 }
  0xa6   : > { %2056 = vmatprep.subr.msk.bf16.mxu0 %vm2863_vm14, %v928_v57  ;;  %vm2867_vm14 = vmmov %vm2864_vm5 }
  0xa8   : > { %2048 = vmatmul.mubr.msk.bf16.vlgmr.msra.gmra.mxu1 %vm2864_vm5, %v2046_v59  ;;  %vm2795_vm5 = vmmov 0  }
  0xa9   : > { %876 = vmatpush1.bf16.msra.mxu1 %v856_v60  ;;  %893 = vmatprep.mubr.bf16.mxu1 %v2241_v0 }
  0xaa   : > { %2101 = vmatprep.subr.mxu1 %v2250_v8 }
  0xac   : > { %2051 = vmatmul.mubr.msk.bf16.vlgmr.msra.gmra.mxu0 %vm2866_vm9, %v2049_v1  ;;  %vm1210_vm9 = vcmask 1043456  }
  0xad   : > { %955 = vmatpush1.bf16.msra.mxu0 %v935_v2  ;;  %972 = vmatprep.mubr.bf16.mxu0 %v2241_v0 }
  0xb0   : > { %2054 = vmatmul.mubr.msk.bf16.vlgmr.msra.gmra.mxu1 %vm2867_vm14, %v2052_v3  ;;  %vm2869_vm14 = vcmask 138240  }
  0xb1   : > { %2103 = vmatprep.mubr.msk.f32.mxu1 %vm2795_vm5, %v2250_v8 }
  0xb4   : > { %2057 = vmatmul.mubr.msk.bf16.vlgmr.msra.gmra.mxu0 %vm2868_vm8, %v2055_v4  ;;  %vm2870_vm8 = vmmov %vm2869_vm14 }
  0xb5   : > { %1249 = vmatprep.mubr.bf16.mxu0 %v2241_v0 }
 0x153   : > { %v382_v9 = vpop.f32.mrf.mxu0 }
 0x155   : > { %v384_v10 = vpop.f32.mrf.mxu0 }
 0x157   : > { %v386_v11 = vpop.f32.mrf.mxu0 }
 0x158   : > { %v432_v12 = vpop.f32.mrf.mxu1 }
 0x159   : > { %v387_v14 = vpop.f32.mrf.mxu0  ;;  %v433_v25 = vadd.f32 %v432_v12, %v382_v9  ;;  %v987_v9 = vpop.permute.xlu0 %986 }
 0x15a   : > { %v434_v62 = vpop.f32.mrf.mxu1 }
 0x15b   : > { %v435_v42 = vadd.f32 %v434_v62, %v384_v10 }
 0x15c   : > { %v436_v49 = vpop.f32.mrf.mxu1  ;;  %v509_v17 = vpop.f32.mrf.mxu0 }
 0x15d   : > { %v516_v33 = vadd.f32 %v509_v17, %v433_v25 }
 0x15e   : > { %v437_v18 = vpop.f32.mrf.mxu1  ;;  %v511_v19 = vpop.f32.mrf.mxu0 }
 0x15f   : > { %v517_v37 = vadd.f32 %v511_v19, %v435_v42 }
 0x160   : > { %v513_v20 = vpop.f32.mrf.mxu0  ;;  %v588_v21 = vpop.f32.mrf.mxu1 }
 0x161   : > { %v595_v38 = vadd.f32 %v588_v21, %v516_v33 }
 0x162   : > { %v514_v22 = vpop.f32.mrf.mxu0  ;;  %v590_v15 = vpop.f32.mrf.mxu1 }
 0x163   : > { %v596_v50 = vadd.f32 %v590_v15, %v517_v37 }
 0x164   : > { %v592_v41 = vpop.f32.mrf.mxu1  ;;  %v658_v54 = vpop.f32.mrf.mxu0 }
 0x165   : > { %v665_v16 = vadd.f32 %v658_v54, %v595_v38 }
 0x166   : > { %v593_v23 = vpop.f32.mrf.mxu1  ;;  %v660_v24 = vpop.f32.mrf.mxu0 }
 0x167   : > { %v666_v56 = vadd.f32 %v660_v24, %v596_v50  ;;  %v2606_v23 = vld [vmem:[%s2783_s4] sm:$0xff] }
 0x168   : > { %v662_v26 = vpop.f32.mrf.mxu0  ;;  %v737_v29 = vpop.f32.mrf.mxu1 }
 0x169   : > { %v744_v57 = vadd.f32 %v737_v29, %v665_v16 }
 0x16a   : > { %v663_v34 = vpop.f32.mrf.mxu0  ;;  %v739_v35 = vpop.f32.mrf.mxu1 }
 0x16b   : > { %v745_v60 = vadd.f32 %v739_v35, %v666_v56  ;;  %v2252_v35 = vmov 1  }
 0x16c   : > { %v741_v45 = vpop.f32.mrf.mxu1  ;;  %v816_v48 = vpop.f32.mrf.mxu0 }
 0x16d   : > { %v823_v63 = vadd.f32 %v816_v48, %v744_v57  ;;  %v2253_v48 = vmov 2  }
 0x16e   : > { %v742_v51 = vpop.f32.mrf.mxu1  ;;  %v818_v52 = vpop.f32.mrf.mxu0 }
 0x16f   : > { %v824_v3 = vadd.f32 %v818_v52, %v745_v60 }
 0x170   : > { %v820_v58 = vpop.f32.mrf.mxu0  ;;  %v895_v59 = vpop.f32.mrf.mxu1 }
 0x171   : > { %v902_v4 = vadd.f32 %v895_v59, %v823_v63 }
 0x172   : > { %v821_v1 = vpop.f32.mrf.mxu0  ;;  %v897_v2 = vpop.f32.mrf.mxu1 }
 0x173   : > { %v903_v12 = vadd.f32 %v897_v2, %v824_v3 }
 0x174   : > { %v899_v10 = vpop.f32.mrf.mxu1  ;;  %v974_v11 = vpop.f32.mrf.mxu0 }
 0x175   : > { %v981_v14 = vadd.f32 %v974_v11, %v902_v4  ;;  %v2640_v11 = vld [vmem:[%s2782_s3 + $0x8] sm:$0xff] }
 0x176   : > { %v900_v62 = vpop.f32.mrf.mxu1  ;;  %v976_v49 = vpop.f32.mrf.mxu0 }
 0x177   : > { %v989_v17 = vadd.f32 %v987_v9, %v981_v14  ;;  %v982_v18 = vadd.f32 %v976_v49, %v903_v12 }
 0x178   : > { %v978_v19 = vpop.f32.mrf.mxu0 }
 0x179   : > { %v990_v20 = vadd.f32 %v987_v9, %v982_v18  ;;  %v994_v15 = vmul.f32 %v989_v17, %v989_v17 }
 0x17a   : > { %v979_v21 = vpop.f32.mrf.mxu0 }
 0x17b   : > { %v991_v22 = vadd.f32 %v990_v20, %v989_v17  ;;  %v995_v41 = vmul.f32 %v990_v20, %v990_v20 }
 0x17d   : > { %992 = vadd.xlane.f32.xlu1 %v991_v22  ;;  %v996_v54 = vadd.f32 %v995_v41, %v994_v15 }
 0x17f   : > { %997 = vadd.xlane.f32.xlu0 %v996_v54 }
 0x206   : > { %v993_v24 = vpop.xlane.xlu1 %992 }
 0x207   : > { %2102 = vmatpush3.msra.mxu1 %v993_v24 }
 0x208   : > { %v998_v25 = vpop.xlane.xlu0 %997  ;;  %2104 = vmatmul.mubr.msk.f32.vlgmr.msra.gmra.mxu1 %vm2797_vm12, %v2606_v23  ;;  %2106 = vmatprep.subr.mxu1 %v2250_v8 }
 0x209   : > { %2107 = vmatpush3.msra.mxu1 %v998_v25  ;;  %2108 = vmatprep.mubr.msk.f32.mxu1 %vm2795_vm5, %v2250_v8  ;;  %vm2871_vm5 = vcmask 130048  }
 0x20c   : > { %2109 = vmatmul.mubr.msk.f32.vlgmr.msra.gmra.mxu1 %vm2797_vm12, %v2606_v23  ;;  %vm2872_vm12 = vmmov %vm2871_vm5 }
 0x20d   : > { %1299 = vmatprep.mubr.bf16.mxu1 %v2241_v0 }
 0x2c8   : > { %v1069_v26 = vpop.f32.mrf.mxu1 }
 0x2c9   : > { %1150 = vperm.xlu1 %2183, %v1069_v26   ;;  %v1143_v42 = vmul.f32 %v1069_v26, %v1069_v26 }
 0x2ca   : > { %v2105_v29 = vpop.f32.mrf.mxu1 }
 0x2cc   : > { %v1139_v33 = vpop.f32.mrf.mxu1 }
 0x2cd   : > { %v1144_v34 = vsub.f32 %v1139_v33, %v1143_v42  ;;  %2184 = vset.pattern.permute.xlu1 %v2252_v35 }
 0x2ce   : > { %v2110_v37 = vpop.f32.mrf.mxu1  ;;  %1163 = vperm.xlu1 %2184, %v2328_v6  }
 0x2cf   : > { %v1145_v38 = vmax.f32 %v1144_v34, 0.0 }
 0x2d1   : > { %v1146_v45 = vadd.f32 1e-05, %v1145_v38 }
 0x2d2   : > { %2185 = vset.pattern.permute.xlu1 %v2253_v48 }
 0x2d3   : > { %2229 = vrsqrt.f32 %v1146_v45  ;;  %1169 = vperm.xlu1 %2185, %v2328_v6  }
 0x2d7   : > { %2226 = vset.pattern.permute.xlu1 %v2241_v0 }
 0x2e0   : > { %v2230_v50 = vpop.eup %2229 }
 0x2e1   : > { %1157 = vperm.xlu0 %2182, %v2230_v50  }
 0x344   : > { %v1151_v16 = vpop.permute.xlu1 %1150 }
 0x345   : > { %v1153_v52 = vsub.f32 %v989_v17, %v1151_v16  ;;  %v1154_v56 = vsub.f32 %v990_v20, %v1151_v16 }
 0x349   : > { %v1164_v51 = vpop.permute.xlu1 %1163 }
 0x34e   : > { %v1170_v60 = vpop.permute.xlu1 %1169 }
 0x35c   : > { %v1158_v57 = vpop.permute.xlu0 %1157 }
 0x35d   : > { %v1160_v58 = vmul.f32 %v1158_v57, %v1153_v52  ;;  %v1161_v59 = vmul.f32 %v1158_v57, %v1154_v56 }
 0x35f   : > { %v1166_v63 = vmul.f32 %v1164_v51, %v1160_v58  ;;  %v1167_v1 = vmul.f32 %v1164_v51, %v1161_v59 }
 0x361   : > { %v1172_v2 = vadd.f32 %v1170_v60, %v1166_v63  ;;  %v1173_v3 = vadd.f32 %v1170_v60, %v1167_v1 }
 0x363   : > { %v2621_v4 = vmax.f32 %v1172_v2, 0.0  ;;  %v2623_v9 = vmax.f32 %v1173_v3, 0.0 }
 0x365   : > { %v2191_v6 = vpack.i.bf16 %v2621_v4, %v2623_v9  ;;  %v2211_v10 = vpack.i.bf16 %v2623_v9, %v2621_v4 }
 0x367   : > { %2192 = vrot.lane.b32.xlu1 %v2191_v6, %s2244_s29  ;;  %2187 = vrot.lane.b32.xlu0 %v2191_v6, %s2242_s27 }
 0x36b   : > { %2202 = vrot.lane.b32.xlu1 %v2191_v6, %s2245_s30  ;;  %2197 = vrot.lane.b32.xlu0 %v2191_v6, %s2243_s28 }
 0x36f   : > { %2212 = vrot.lane.b32.xlu1 %v2211_v10, %s2247_s8  ;;  %2207 = vrot.lane.b32.xlu0 %v2211_v10, %s2246_s7 }
 0x373   : > { %2222 = vrot.lane.b32.xlu1 %v2211_v10, %s2249_s10  ;;  %2217 = vrot.lane.b32.xlu0 %v2211_v10, %s2248_s9 }
 0x377   : > { %1772 = vperm.xlu0 %2182, %v2640_v11  }
 0x3d9   : > { %v2193_v12 = vpop.permute.xlu1 %2192  ;;  %v2188_v14 = vpop.permute.xlu0 %2187 }
 0x3da   : > { %v2195_v62 = vunpack.i.h.bf16 %v2193_v12  ;;  %v2194_v49 = vunpack.i.l.bf16 %v2193_v12  ;;  %v2190_v17 = vunpack.i.h.bf16 %v2188_v14  ;;  %v2189_v18 = vunpack.i.l.bf16 %v2188_v14 }
 0x3dc   : > { %v1183_v19 = vsel %vm2869_vm14, %v2195_v62, %v2194_v49  ;;  %v1186_v20 = vsel %vm2870_vm8, %v2194_v49, %v2195_v62  ;;  %v1197_v21 = vsel %vm2871_vm5, %v2190_v17, %v2189_v18  ;;  %v1200_v22 = vsel %vm2872_vm12, %v2189_v18, %v2190_v17 }
 0x3dd   : > { %v1188_v15 = vsel %vm2392_vm0, %v1183_v19, 0.0  ;;  %v1202_v41 = vsel %vm2382_vm11, %v1197_v21, 0.0  ;;  %v2203_v54 = vpop.permute.xlu1 %2202  ;;  %v2198_v24 = vpop.permute.xlu0 %2197  ;;  %v1187_v25 = vsel %vm2410_vm3, %v1186_v20, 0.0  ;;  %v1201_v26 = vsel %vm2388_vm15, %v1200_v22, 0.0 }
 0x3de   : > { %v2205_v29 = vunpack.i.h.bf16 %v2203_v54  ;;  %v2204_v42 = vunpack.i.l.bf16 %v2203_v54  ;;  %v2200_v33 = vunpack.i.h.bf16 %v2198_v24  ;;  %v2199_v34 = vunpack.i.l.bf16 %v2198_v24 }
 0x3df   : > { %v1204_v37 = vpack.c.bf16 %v1202_v41, %v1202_v41  ;;  %v1190_v38 = vpack.c.bf16 %v1188_v15, %v1188_v15  ;;  %v1189_v45 = vpack.c.bf16 %v1187_v25, %v1187_v25  ;;  %v1203_v40 = vpack.c.bf16 %v1201_v26, %v1201_v26 }
 0x3e0   : > { %vm2873_vm0 = vcmask 7168   ;;  %vm2875_vm11 = vcmask 121856   ;;  %vm2877_vm15 = vnez %v2809_v43  ;;  %v2060_v43 = vld [vmem:[%s2781_s2 + $0x4] sm:$0xf]  ;;  %vm2878_vm3 = vnez %v2815_v47 }
 0x3e1   : > { %v1380_v50 = vsel %vm2873_vm0, %v2205_v29, %v2204_v42  ;;  %vm2874_vm5 = vmmov %vm2873_vm0  ;;  %v1313_v16 = vsel %vm2875_vm11, %v2200_v33, %v2199_v34  ;;  %2061 = vmatprep.subr.msk.bf16.mxu0 %vm1210_vm9, %v1204_v37  ;;  %2063 = vmatprep.subr.msk.bf16.mxu1 %vm1210_vm9, %v1190_v38  ;;  %v2213_v52 = vpop.permute.xlu1 %2212  ;;  %v1262_v56 = vsel %vm1210_vm9, %v1189_v45, 0  ;;  %v2208_v57 = vpop.permute.xlu0 %2207  ;;  %v1212_v58 = vsel %vm1210_vm9, %v1203_v40, 0 }
 0x3e2   : > { %v1383_v36 = vsel %vm2874_vm5, %v2204_v42, %v2205_v29  ;;  %vm2876_vm12 = vmmov %vm2875_vm11  ;;  %v1385_v39 = vsel %vm2415_vm4, %v1380_v50, 0.0  ;;  %v1318_v51 = vsel %vm2877_vm15, %v1313_v16, 0.0  ;;  %v2215_v59 = vunpack.i.h.bf16 %v2213_v52  ;;  %1282 = vmatpush1.bf16.msra.mxu1 %v1262_v56  ;;  %1232 = vmatpush1.bf16.msra.mxu0 %v1212_v58  ;;  %v2077_v58 = vld [vmem:[%s2781_s2 + $0x18] sm:$0xf] }
 0x3e3   : > { %v1316_v44 = vsel %vm2876_vm12, %v2199_v34, %v2200_v33  ;;  %v2214_v60 = vunpack.i.l.bf16 %v2213_v52  ;;  %v2210_v63 = vunpack.i.h.bf16 %v2208_v57  ;;  %v2209_v1 = vunpack.i.l.bf16 %v2208_v57 }
 0x3e4   : > { %v1320_v2 = vpack.c.bf16 %v1318_v51, %v1318_v51  ;;  %v1387_v3 = vpack.c.bf16 %v1385_v39, %v1385_v39  ;;  %v1384_v6 = vsel %vm2430_vm2, %v1383_v36, 0.0  ;;  %v1317_v10 = vsel %vm2878_vm3, %v1316_v44, 0.0 }
 0x3e5   : > { %vm2879_vm4 = vcmask 1039360   ;;  %vm2881_vm8 = vcmask 64512   ;;  %v1386_v49 = vpack.c.bf16 %v1384_v6, %v1384_v6  ;;  %v2218_v17 = vpop.permute.xlu0 %2217  ;;  %v1319_v18 = vpack.c.bf16 %v1317_v10, %v1317_v10 }
 0x3e6   : > { %v1504_v12 = vsel %vm2879_vm4, %v2209_v1, %v2210_v63  ;;  %vm2880_vm14 = vmmov %vm2879_vm4  ;;  %2062 = vmatmul.mubr.msk.bf16.vlgmr.msra.gmra.mxu0 %vm2881_vm8, %v2060_v43  ;;  %vm2883_vm2 = vnez %v2799_v31  ;;  %vm2884_vm5 = vcmask 924672   ;;  %2066 = vmatprep.subr.msk.bf16.mxu0 %vm1210_vm9, %v1320_v2  ;;  %v2220_v19 = vunpack.i.h.bf16 %v2218_v17 }
 0x3e7   : > { %v1508_v14 = vsel %vm2880_vm14, %v2210_v63, %v2209_v1  ;;  %vm2882_vm0 = vmmov %vm2881_vm8  ;;  %v1443_v53 = vsel %vm2883_vm2, %v2623_v9, 0.0  ;;  %v1575_v47 = vsel %vm2884_vm5, %v2215_v59, %v2214_v60  ;;  %2069 = vmatprep.subr.msk.bf16.mxu1 %vm1210_vm9, %v1387_v3  ;;  %v2219_v61 = vunpack.i.l.bf16 %v2218_v17  ;;  %1364 = vmatprep.mubr.bf16.mxu0 %v2241_v0  ;;  %v2223_v9 = vpop.permute.xlu1 %2222 }
 0x3e8   : > { %v1510_v62 = vsel %vm2439_vm13, %v1508_v14, 0.0  ;;  %2064 = vmatmul.mubr.msk.bf16.vlgmr.msra.gmra.mxu1 %vm2882_vm0, %v1191_v46  ;;  %vm2885_vm13 = vnez %v2801_v32  ;;  %v1394_v21 = vsel %vm1210_vm9, %v1386_v49, 0  ;;  %v1327_v22 = vsel %vm1210_vm9, %v1319_v18, 0  ;;  %vm2887_vm12 = vmmov %vm2884_vm5 }
 0x3e9   : > { %v1442_v20 = vsel %vm2885_vm13, %v2621_v4, 0.0  ;;  %v1512_v15 = vpack.c.bf16 %v1510_v62, %v1510_v62  ;;  %1431 = vmatprep.mubr.bf16.mxu1 %v2241_v0  ;;  %v1509_v31 = vsel %vm2462_vm10, %v1504_v12, 0.0  ;;  %1414 = vmatpush1.bf16.msra.mxu1 %v1394_v21  ;;  %vm2886_vm11 = vcmask 916480   ;;  %vm2890_vm10 = vmmov %vm2882_vm0 }
 0x3ea   : > { %v1642_v41 = vsel %vm2886_vm11, %v2220_v19, %v2219_v61  ;;  %v1445_v54 = vpack.c.bf16 %v1443_v53, %v1443_v53  ;;  %1347 = vmatpush1.bf16.msra.mxu0 %v1327_v22  ;;  %v1444_v4 = vpack.c.bf16 %v1442_v20, %v1442_v20  ;;  %v1511_v24 = vpack.c.bf16 %v1509_v31, %v1509_v31  ;;  %vm2891_vm3 = vmmov %vm2882_vm0 }
 0x3eb   : > { %v1644_v32 = vsel %vm2501_vm6, %v1642_v41, 0.0  ;;  %2075 = vmatprep.subr.msk.bf16.mxu1 %vm1210_vm9, %v1512_v15  ;;  %v1571_v25 = vsel %vm2887_vm12, %v2214_v60, %v2215_v59  ;;  %vm2888_vm15 = vnez %v2821_v5  ;;  %v2225_v29 = vunpack.i.h.bf16 %v2223_v9  ;;  %vm2889_vm6 = vmmov %vm2886_vm11  ;;  %v2080_v59 = vld [vmem:[%s2781_s2 + $0x1c] sm:$0xf]  ;;  %v2083_v60 = vld [vmem:[%s2781_s2 + $0x20] sm:$0xf] }
 0x3ec   : > { %v1577_v26 = vsel %vm2888_vm15, %v1575_v47, 0.0  ;;  %2072 = vmatprep.subr.msk.bf16.mxu0 %vm1210_vm9, %v1445_v54  ;;  %v2224_v42 = vunpack.i.l.bf16 %v2223_v9  ;;  %v1638_v33 = vsel %vm2889_vm6, %v2219_v61, %v2220_v19  ;;  %v1646_v34 = vpack.c.bf16 %v1644_v32, %v1644_v32  ;;  %vm2896_vm2 = vmmov %vm2882_vm0 }
 0x3ed   : > { %v1452_v5 = vsel %vm1210_vm9, %v1444_v4, 0  ;;  %v1519_v37 = vsel %vm1210_vm9, %v1511_v24, 0  ;;  %v1579_v38 = vpack.c.bf16 %v1577_v26, %v1577_v26  ;;  %vm2892_vm4 = vnez %v2830_v28  ;;  %v2071_v28 = vld [vmem:[%s2781_s2 + $0x10] sm:$0xf]  ;;  %vm2897_vm5 = vmmov %vm2882_vm0 }
 0x3ee   : > { %2067 = vmatmul.mubr.msk.bf16.vlgmr.msra.gmra.mxu0 %vm2890_vm10, %v2065_v13  ;;  %v1576_v45 = vsel %vm2892_vm4, %v1571_v25, 0.0  ;;  %v1643_v40 = vsel %vm2539_vm7, %v1638_v33, 0.0  ;;  %vm2893_vm14 = vcmask 908288   ;;  %vm2894_vm8 = vnez %v2855_v55  ;;  %vm2900_vm11 = vmmov %vm2882_vm0 }
 0x3ef   : > { %1472 = vmatpush1.bf16.msra.mxu0 %v1452_v5  ;;  %v1709_v50 = vsel %vm2893_vm14, %v2225_v29, %v2224_v42  ;;  %1489 = vmatprep.mubr.bf16.mxu0 %v2241_v0  ;;  %v1578_v36 = vpack.c.bf16 %v1576_v45, %v1576_v45  ;;  %v1645_v16 = vpack.c.bf16 %v1643_v40, %v1643_v40  ;;  %vm2895_vm7 = vmmov %vm2893_vm14  ;;  %vm2899_vm13 = vmmov 0  }
 0x3f0   : > { %2070 = vmatmul.mubr.msk.bf16.vlgmr.msra.gmra.mxu1 %vm2891_vm3, %v2068_v7  ;;  %2078 = vmatprep.subr.msk.bf16.mxu0 %vm1210_vm9, %v1579_v38  ;;  %v1711_v44 = vsel %vm2894_vm8, %v1709_v50, 0.0  ;;  %v1705_v39 = vsel %vm2895_vm7, %v2224_v42, %v2225_v29  ;;  %vm2902_vm12 = vmmov %vm2882_vm0 }
 0x3f1   : > { %1539 = vmatpush1.bf16.msra.mxu1 %v1519_v37  ;;  %1556 = vmatprep.mubr.bf16.mxu1 %v2241_v0  ;;  %v1586_v51 = vsel %vm1210_vm9, %v1578_v36, 0  ;;  %v1653_v52 = vsel %vm1210_vm9, %v1645_v16, 0  ;;  %v1713_v55 = vpack.c.bf16 %v1711_v44, %v1711_v44  ;;  %v1710_v56 = vsel %vm2564_vm1, %v1705_v39, 0.0  ;;  %vm2898_vm1 = vmmov %vm2882_vm0 }
 0x3f2   : > { %2081 = vmatprep.subr.msk.bf16.mxu1 %vm1210_vm9, %v1646_v34  ;;  %v1712_v57 = vpack.c.bf16 %v1710_v56, %v1710_v56 }
 0x3f4   : > { %v1720_v27 = vsel %vm1210_vm9, %v1712_v57, 0 }
 0x3f6   : > { %2073 = vmatmul.mubr.msk.bf16.vlgmr.msra.gmra.mxu0 %vm2882_vm0, %v2071_v28 }
 0x3f7   : > { %1606 = vmatpush1.bf16.msra.mxu0 %v1586_v51  ;;  %1623 = vmatprep.mubr.bf16.mxu0 %v2241_v0 }
 0x3f8   : > { %2076 = vmatmul.mubr.msk.bf16.vlgmr.msra.gmra.mxu1 %vm2896_vm2, %v2074_v30  ;;  %2084 = vmatprep.subr.msk.bf16.mxu0 %vm1210_vm9, %v1713_v55  ;;  %v1773_v30 = vpop.permute.xlu0 %1772  ;;  %vm2901_vm9 = vmmov %vm2882_vm0 }
 0x3f9   : > { %1673 = vmatpush1.bf16.msra.mxu1 %v1653_v52  ;;  %1690 = vmatprep.mubr.bf16.mxu1 %v2241_v0 }
 0x3fa   : > { %2111 = vmatprep.subr.mxu1 %v2250_v8 }
 0x3fe   : > { %2079 = vmatmul.mubr.msk.bf16.vlgmr.msra.gmra.mxu0 %vm2897_vm5, %v2077_v58 }
 0x3ff   : > { %1740 = vmatpush1.bf16.msra.mxu0 %v1720_v27  ;;  %1757 = vmatprep.mubr.bf16.mxu0 %v2241_v0 }
 0x400   : > { %2082 = vmatmul.mubr.msk.bf16.vlgmr.msra.gmra.mxu1 %vm2898_vm1, %v2080_v59 }
 0x401   : > { %2113 = vmatprep.mubr.msk.f32.mxu1 %vm2899_vm13, %v2250_v8 }
 0x406   : > { %2085 = vmatmul.mubr.msk.bf16.vlgmr.msra.gmra.mxu0 %vm2900_vm11, %v2083_v60 }
 0x4a6   : > { %v1251_v63 = vpop.f32.mrf.mxu0 }
 0x4a8   : > { %v1301_v1 = vpop.f32.mrf.mxu1  ;;  %v1253_v43 = vpop.f32.mrf.mxu0 }
 0x4a9   : > { %v1302_v18 = vadd.f32 %v1301_v1, %v1251_v63 }
 0x4aa   : > { %v1303_v46 = vpop.f32.mrf.mxu1  ;;  %v1255_v2 = vpop.f32.mrf.mxu0 }
 0x4ab   : > { %v1304_v19 = vadd.f32 %v1303_v46, %v1253_v43 }
 0x4ac   : > { %v1305_v3 = vpop.f32.mrf.mxu1  ;;  %v1256_v6 = vpop.f32.mrf.mxu0 }
 0x4ae   : > { %v1306_v10 = vpop.f32.mrf.mxu1  ;;  %v1366_v12 = vpop.f32.mrf.mxu0 }
 0x4af   : > { %v1373_v61 = vadd.f32 %v1366_v12, %v1302_v18 }
 0x4b0   : > { %v1433_v14 = vpop.f32.mrf.mxu1  ;;  %v1368_v0 = vpop.f32.mrf.mxu0 }
 0x4b1   : > { %v1374_v22 = vadd.f32 %v1368_v0, %v1304_v19  ;;  %v1440_v9 = vadd.f32 %v1433_v14, %v1373_v61 }
 0x4b2   : > { %v1435_v62 = vpop.f32.mrf.mxu1  ;;  %v1370_v49 = vpop.f32.mrf.mxu0 }
 0x4b3   : > { %v1441_v32 = vadd.f32 %v1435_v62, %v1374_v22 }
 0x4b4   : > { %v1437_v17 = vpop.f32.mrf.mxu1  ;;  %v1371_v53 = vpop.f32.mrf.mxu0 }
 0x4b6   : > { %v1438_v47 = vpop.f32.mrf.mxu1  ;;  %v1491_v20 = vpop.f32.mrf.mxu0 }
 0x4b7   : > { %v1498_v4 = vadd.f32 %v1491_v20, %v1440_v9 }
 0x4b8   : > { %v1558_v21 = vpop.f32.mrf.mxu1  ;;  %v1493_v15 = vpop.f32.mrf.mxu0 }
 0x4b9   : > { %v1499_v26 = vadd.f32 %v1493_v15, %v1441_v32  ;;  %v1565_v29 = vadd.f32 %v1558_v21, %v1498_v4 }
 0x4ba   : > { %v1560_v31 = vpop.f32.mrf.mxu1  ;;  %v1495_v41 = vpop.f32.mrf.mxu0 }
 0x4bb   : > { %v1566_v34 = vadd.f32 %v1560_v31, %v1499_v26 }
 0x4bc   : > { %v1562_v54 = vpop.f32.mrf.mxu1  ;;  %v1496_v24 = vpop.f32.mrf.mxu0 }
 0x4be   : > { %v1563_v25 = vpop.f32.mrf.mxu1  ;;  %v1625_v13 = vpop.f32.mrf.mxu0 }
 0x4bf   : > { %v1632_v5 = vadd.f32 %v1625_v13, %v1565_v29 }
 0x4c0   : > { %v1692_v7 = vpop.f32.mrf.mxu1  ;;  %v1627_v42 = vpop.f32.mrf.mxu0 }
 0x4c1   : > { %v1633_v45 = vadd.f32 %v1627_v42, %v1566_v34  ;;  %v1699_v36 = vadd.f32 %v1692_v7, %v1632_v5 }
 0x4c2   : > { %v1694_v33 = vpop.f32.mrf.mxu1  ;;  %v1629_v37 = vpop.f32.mrf.mxu0 }
 0x4c3   : > { %v1700_v44 = vadd.f32 %v1694_v33, %v1633_v45 }
 0x4c4   : > { %v1696_v38 = vpop.f32.mrf.mxu1  ;;  %v1630_v40 = vpop.f32.mrf.mxu0 }
 0x4c6   : > { %v1697_v50 = vpop.f32.mrf.mxu1  ;;  %v1759_v16 = vpop.f32.mrf.mxu0 }
 0x4c7   : > { %v1766_v28 = vadd.f32 %v1759_v16, %v1699_v36 }
 0x4c8   : > { %v1761_v39 = vpop.f32.mrf.mxu0 }
 0x4c9   : > { %v1775_v51 = vadd.f32 %v1773_v30, %v1766_v28  ;;  %v1767_v52 = vadd.f32 %v1761_v39, %v1700_v44 }
 0x4ca   : > { %v1763_v55 = vpop.f32.mrf.mxu0 }
 0x4cb   : > { %v1776_v56 = vadd.f32 %v1773_v30, %v1767_v52  ;;  %v1780_v59 = vmul.f32 %v1775_v51, %v1775_v51 }
 0x4cc   : > { %v1764_v57 = vpop.f32.mrf.mxu0 }
 0x4cd   : > { %v1777_v58 = vadd.f32 %v1776_v56, %v1775_v51  ;;  %v1781_v27 = vmul.f32 %v1776_v56, %v1776_v56 }
 0x4cf   : > { %1778 = vadd.xlane.f32.xlu1 %v1777_v58  ;;  %v1782_v60 = vadd.f32 %v1781_v27, %v1780_v59 }
 0x4d1   : > { %1783 = vadd.xlane.f32.xlu0 %v1782_v60 }
 0x558   : > { %v1779_v63 = vpop.xlane.xlu1 %1778 }
 0x559   : > { %2112 = vmatpush3.msra.mxu1 %v1779_v63 }
 0x55a   : > { %v1784_v1 = vpop.xlane.xlu0 %1783  ;;  %2114 = vmatmul.mubr.msk.f32.vlgmr.msra.gmra.mxu1 %vm2901_vm9, %v2606_v23  ;;  %2116 = vmatprep.subr.mxu1 %v2250_v8 }
 0x55b   : > { %2117 = vmatpush3.msra.mxu1 %v1784_v1  ;;  %2118 = vmatprep.mubr.msk.f32.mxu1 %vm2899_vm13, %v2250_v8 }
 0x55e   : > { %2119 = vmatmul.mubr.msk.f32.vlgmr.msra.gmra.mxu1 %vm2902_vm12, %v2606_v23 }
 0x61a   : > { %v1851_v43 = vpop.f32.mrf.mxu1 }
 0x61b   : > { %1932 = vperm.xlu0 %2182, %v1851_v43   ;;  %v1925_v2 = vmul.f32 %v1851_v43, %v1851_v43 }
 0x61c   : > { %v2115_v46 = vpop.f32.mrf.mxu1 }
 0x61e   : > { %v1921_v3 = vpop.f32.mrf.mxu1 }
 0x61f   : > { %v1926_v6 = vsub.f32 %v1921_v3, %v1925_v2  ;;  %2228 = vset.pattern.permute.xlu0 %v2253_v48 }
 0x620   : > { %v2120_v10 = vpop.f32.mrf.mxu1  ;;  %1951 = vperm.xlu0 %2228, %v2640_v11  }
 0x621   : > { %v1927_v12 = vmax.f32 %v1926_v6, 0.0 }
 0x623   : > { %v1928_v14 = vadd.f32 1e-05, %v1927_v12 }
 0x625   : > { %2231 = vrsqrt.f32 %v1928_v14 }
 0x632   : > { %v2232_v0 = vpop.eup %2231 }
 0x633   : > { %1939 = vperm.xlu1 %2226, %v2232_v0  }
 0x637   : > { %2227 = vset.pattern.permute.xlu1 %v2252_v35 }
 0x638   : > { %1945 = vperm.xlu1 %2227, %v2640_v11  }
 0x696   : > { %v1933_v8 = vpop.permute.xlu0 %1932 }
 0x697   : > { %v1935_v62 = vsub.f32 %v1775_v51, %v1933_v8  ;;  %v1936_v49 = vsub.f32 %v1776_v56, %v1933_v8 }
 0x69b   : > { %v1952_v53 = vpop.permute.xlu0 %1951 }
 0x6ae   : > { %v1940_v23 = vpop.permute.xlu1 %1939 }
 0x6af   : > { %v1942_v17 = vmul.f32 %v1940_v23, %v1935_v62  ;;  %v1943_v18 = vmul.f32 %v1940_v23, %v1936_v49 }
 0x6b3   : > { %v1946_v48 = vpop.permute.xlu1 %1945 }
 0x6b4   : > { %v1948_v47 = vmul.f32 %v1946_v48, %v1942_v17  ;;  %v1949_v19 = vmul.f32 %v1946_v48, %v1943_v18 }
 0x6b6   : > { %v1954_v61 = vadd.f32 %v1952_v53, %v1948_v47  ;;  %v1955_v20 = vadd.f32 %v1952_v53, %v1949_v19 }
 0x6b8   : > { %v1956_v35 = vmax.f32 %v1954_v61, 0.0  ;;  %v1957_v21 = vmax.f32 %v1955_v20, 0.0 }
 0x6ba   : > { %1958 = vst [vmem:[%s251_s26] sm:$0xff] %v1956_v35  ;;  %1959 = vst [vmem:[%s251_s26 + $0x8] sm:$0xff] %v1957_v21 }
 0x6bb PF: > { %s16_s21 = sadd.s32 1, %s2239_s21  }
 0x6bc   : > { %p13_p4 = scmp.ge.s32.totalorder %s16_s21, 4  }
 0x6be   :  { %15 = sbr.rel (!%p13_p4) target bundleno = 1 (0x1), region = 99 }

</bundles_post_ra>
